<compile_context>
chip_gen: v5e
topology: v5e:2x2
jax: 0.10.0
libtpu: 0.0.40
codegen_flags: <defaults>
</compile_context>

<pallas_src>
import jax
import jax.numpy as jnp
from jax.experimental import pallas as pl
from jax.experimental.pallas import tpu as pltpu


# ----------------------------- Pallas kernel --------------------------------

def vae_kernel(x_ref, eps_ref, *refs):
    """refs = 12 x (w_ref[bf16], b_ref[f32]) followed by (xrec_ref, musig_ref)."""
    wb = refs[:24]
    xrec_ref, musig_ref = refs[24], refs[25]

    def lin(i, h):
        # bf16 operands into the MXU, f32 accumulation, f32 bias add on the VPU.
        w_ref, b_ref = wb[2 * i], wb[2 * i + 1]
        return (
            jnp.dot(h.astype(jnp.bfloat16), w_ref[...],
                    preferred_element_type=jnp.float32)
            + b_ref[...]
        )

    relu = lambda v: jnp.maximum(v, 0.0)

    x = x_ref[...]                      # (TB, input_dim) f32

    # ---- encoder: q_phi(z | x) ----
    h = relu(lin(0, x))                 # img_2hid1
    h = relu(lin(1, h))                 # hid1_2hid2
    h = relu(lin(2, h))                 # hid2_2hid3
    h = relu(lin(3, h))                 # hid3_2hid4
    h = relu(lin(4, h))                 # hid4_2hid5
    mu_sigma = lin(5, h)                # fused [hid2_2mu | hid2_2sigma] -> (TB, 2*z)

    # ---- reparameterization trick ----
    z_dim = eps_ref.shape[-1]
    mu = mu_sigma[:, :z_dim]
    sigma = mu_sigma[:, z_dim:]
    z = mu + sigma * eps_ref[...]

    # ---- decoder: p_theta(x | z) ----
    d = relu(lin(6, z))                 # z_2hid5
    d = relu(lin(7, d))                 # hid5_2hid4
    d = relu(lin(8, d))                 # hid4_2hid3
    d = relu(lin(9, d))                 # hid3_2hid2
    d = relu(lin(10, d))                # hid2_2hid1
    xrec_ref[...] = jax.nn.sigmoid(lin(11, d))   # hid1_2img + sigmoid
    musig_ref[...] = mu_sigma


# ------------------------------ Wrapper --------------------------------------

def prepare_params(params):
    """Fuse mu/sigma heads into one layer and cast weights to bf16 (biases f32).

    params: list of 13 (w, b) tuples, w: (in_dim, out_dim), b: (1, out_dim).
    returns 12 fused/cast (w_bf16, b_f32) tuples.
    """
    w_mu, b_mu = params[5]
    w_sg, b_sg = params[6]
    w_ms = jnp.concatenate([w_mu, w_sg], axis=1)   # (h5, 2*z_dim)
    b_ms = jnp.concatenate([b_mu, b_sg], axis=1)   # (1,  2*z_dim)
    fused = list(params[:5]) + [(w_ms, b_ms)] + list(params[7:])
    return [(w.astype(jnp.bfloat16), b.astype(jnp.float32)) for w, b in fused]


def vae_forward(x, eps, params, *, tb=128):
    """Runs the full VAE forward in one pallas_call, grid over the batch."""
    fused = prepare_params(params)
    flat = []
    for w, b in fused:
        flat += [w, b]

    batch, input_dim = x.shape
    z_dim = eps.shape[-1]
    assert batch % tb == 0, "batch must be a multiple of the batch tile"

    in_specs = [
        pl.BlockSpec((tb, input_dim), lambda i: (i, 0)),   # x tile
        pl.BlockSpec((tb, z_dim), lambda i: (i, 0)),       # eps tile
    ]
    # Weights / biases: whole-array blocks with constant index_map -> resident
    # in VMEM across all grid steps (no re-DMA per batch tile).
    for arr in flat:
        in_specs.append(pl.BlockSpec(arr.shape, lambda i: (0, 0)))

    out_shape = (
        jax.ShapeDtypeStruct((batch, input_dim), jnp.float32),    # x_reconstructed
        jax.ShapeDtypeStruct((batch, 2 * z_dim), jnp.float32),    # [mu | sigma]
    )
    out_specs = (
        pl.BlockSpec((tb, input_dim), lambda i: (i, 0)),
        pl.BlockSpec((tb, 2 * z_dim), lambda i: (i, 0)),
    )

    x_rec, mu_sigma = pl.pallas_call(
        vae_kernel,
        out_shape=out_shape,
        grid=(batch // tb,),
        in_specs=in_specs,
        out_specs=out_specs,
        compiler_params=pltpu.CompilerParams(
            dimension_semantics=("parallel",),   # shard batch tiles across TCs (v7x)
        ),
    )(x, eps, *flat)

    mu = mu_sigma[:, :z_dim]
    sigma = mu_sigma[:, z_dim:]
    return x_rec, mu, sigma


# ------------------------- Deterministic parameter init ----------------------

def init_params(key, layer_dims):
    """PyTorch-style nn.Linear init: U(-1/sqrt(fan_in), 1/sqrt(fan_in))."""
    params = []
    for din, dout in layer_dims:
        key, kw, kb = jax.random.split(key, 3)
        bound = 1.0 / float(din) ** 0.5
        w = jax.random.uniform(kw, (din, dout), jnp.float32, -bound, bound)
        b = jax.random.uniform(kb, (1, dout), jnp.float32, -bound, bound)
        params.append((w, b))
    return params


# --------------------------------- Main ---------------------------------------

if __name__ == "__main__":
    # Small-but-representative dims. input_dim is a multiple of 128 so the
    # reconstructed-image store is lane-dense; real MNIST would pad 784 -> 896.
    input_dim, h1, h2, h3, h4, h5, z_dim = 128, 96, 80, 64, 48, 32, 16
    batch, tb = 256, 128

    layer_dims = [
        (input_dim, h1),   # img_2hid1
        (h1, h2),          # hid1_2hid2
        (h2, h3),          # hid2_2hid3
        (h3, h4),          # hid3_2hid4
        (h4, h5),          # hid4_2hid5
        (h5, z_dim),       # hid2_2mu
        (h5, z_dim),       # hid2_2sigma
        (z_dim, h5),       # z_2hid5
        (h5, h4),          # hid5_2hid4
        (h4, h3),          # hid4_2hid3
        (h3, h2),          # hid3_2hid2
        (h2, h1),          # hid2_2hid1
        (h1, input_dim),   # hid1_2img
    ]

    key = jax.random.PRNGKey(0)
    key, kp, kx, ke = jax.random.split(key, 4)
    params = init_params(kp, layer_dims)
    x = jax.random.uniform(kx, (batch, input_dim), jnp.float32)
    # epsilon ~ N(0, I), drawn outside the kernel (matches torch.randn_like(sigma)).
    eps = jax.random.normal(ke, (batch, z_dim), jnp.float32)

    x_rec, mu, sigma = vae_forward(x, eps, params, tb=tb)
    jax.block_until_ready((x_rec, mu, sigma))

    # Sanity check vs. plain-JAX reference of the same (bf16-matmul) math.
    def ref_forward(x, eps, fused):
        def lin(h, w, b):
            return jnp.dot(h.astype(jnp.bfloat16), w,
                           preferred_element_type=jnp.float32) + b
        r = lambda v: jnp.maximum(v, 0.0)
        h = x
        for i in range(5):
            h = r(lin(h, *fused[i]))
        ms = lin(h, *fused[5])
        mu_r, sg_r = ms[:, :z_dim], ms[:, z_dim:]
        d = mu_r + sg_r * eps
        for i in range(6, 11):
            d = r(lin(d, *fused[i]))
        return jax.nn.sigmoid(lin(d, *fused[11])), mu_r, sg_r

    fused = prepare_params(params)
    xr_ref, mu_ref, sg_ref = ref_forward(x, eps, fused)
    assert jnp.allclose(x_rec, xr_ref, atol=5e-3, rtol=5e-3)
    assert jnp.allclose(mu, mu_ref, atol=5e-3, rtol=5e-3)
    assert jnp.allclose(sigma, sg_ref, atol=5e-3, rtol=5e-3)

    print("KERNEL_OK")
</pallas_src>

<mosaic_0001>
module attributes {stable_mosaic.version = 11 : i64} {
  func.func @vae_kernel(%arg0: i32, %arg1: memref<128x128xf32, #tpu.memory_space<vmem>>, %arg2: memref<128x16xf32, #tpu.memory_space<vmem>>, %arg3: memref<128x96xbf16, #tpu.memory_space<vmem>>, %arg4: memref<1x96xf32, #tpu.memory_space<vmem>>, %arg5: memref<96x80xbf16, #tpu.memory_space<vmem>>, %arg6: memref<1x80xf32, #tpu.memory_space<vmem>>, %arg7: memref<80x64xbf16, #tpu.memory_space<vmem>>, %arg8: memref<1x64xf32, #tpu.memory_space<vmem>>, %arg9: memref<64x48xbf16, #tpu.memory_space<vmem>>, %arg10: memref<1x48xf32, #tpu.memory_space<vmem>>, %arg11: memref<48x32xbf16, #tpu.memory_space<vmem>>, %arg12: memref<1x32xf32, #tpu.memory_space<vmem>>, %arg13: memref<32x32xbf16, #tpu.memory_space<vmem>>, %arg14: memref<1x32xf32, #tpu.memory_space<vmem>>, %arg15: memref<16x32xbf16, #tpu.memory_space<vmem>>, %arg16: memref<1x32xf32, #tpu.memory_space<vmem>>, %arg17: memref<32x48xbf16, #tpu.memory_space<vmem>>, %arg18: memref<1x48xf32, #tpu.memory_space<vmem>>, %arg19: memref<48x64xbf16, #tpu.memory_space<vmem>>, %arg20: memref<1x64xf32, #tpu.memory_space<vmem>>, %arg21: memref<64x80xbf16, #tpu.memory_space<vmem>>, %arg22: memref<1x80xf32, #tpu.memory_space<vmem>>, %arg23: memref<80x96xbf16, #tpu.memory_space<vmem>>, %arg24: memref<1x96xf32, #tpu.memory_space<vmem>>, %arg25: memref<96x128xbf16, #tpu.memory_space<vmem>>, %arg26: memref<1x128xf32, #tpu.memory_space<vmem>>, %arg27: memref<128x128xf32, #tpu.memory_space<vmem>>, %arg28: memref<128x32xf32, #tpu.memory_space<vmem>>) attributes {dimension_semantics = [#tpu.dimension_semantics<parallel>], iteration_bounds = array<i64: 2>, scalar_prefetch = 0 : i64, scratch_operands = 0 : i64, tpu.core_type = #tpu.core_type<tc>, window_params = [{transform_indices = @transform_0, window_bounds = array<i64: 128, 128>}, {transform_indices = @transform_1, window_bounds = array<i64: 128, 16>}, {pipeline_mode = #tpu.pipeline_mode<synchronous>, transform_indices = @transform_2, window_bounds = array<i64: 128, 96>}, {pipeline_mode = #tpu.pipeline_mode<synchronous>, transform_indices = @transform_3, window_bounds = array<i64: 1, 96>}, {pipeline_mode = #tpu.pipeline_mode<synchronous>, transform_indices = @transform_4, window_bounds = array<i64: 96, 80>}, {pipeline_mode = #tpu.pipeline_mode<synchronous>, transform_indices = @transform_5, window_bounds = array<i64: 1, 80>}, {pipeline_mode = #tpu.pipeline_mode<synchronous>, transform_indices = @transform_6, window_bounds = array<i64: 80, 64>}, {pipeline_mode = #tpu.pipeline_mode<synchronous>, transform_indices = @transform_7, window_bounds = array<i64: 1, 64>}, {pipeline_mode = #tpu.pipeline_mode<synchronous>, transform_indices = @transform_8, window_bounds = array<i64: 64, 48>}, {pipeline_mode = #tpu.pipeline_mode<synchronous>, transform_indices = @transform_9, window_bounds = array<i64: 1, 48>}, {pipeline_mode = #tpu.pipeline_mode<synchronous>, transform_indices = @transform_10, window_bounds = array<i64: 48, 32>}, {pipeline_mode = #tpu.pipeline_mode<synchronous>, transform_indices = @transform_11, window_bounds = array<i64: 1, 32>}, {pipeline_mode = #tpu.pipeline_mode<synchronous>, transform_indices = @transform_12, window_bounds = array<i64: 32, 32>}, {pipeline_mode = #tpu.pipeline_mode<synchronous>, transform_indices = @transform_13, window_bounds = array<i64: 1, 32>}, {pipeline_mode = #tpu.pipeline_mode<synchronous>, transform_indices = @transform_14, window_bounds = array<i64: 16, 32>}, {pipeline_mode = #tpu.pipeline_mode<synchronous>, transform_indices = @transform_15, window_bounds = array<i64: 1, 32>}, {pipeline_mode = #tpu.pipeline_mode<synchronous>, transform_indices = @transform_16, window_bounds = array<i64: 32, 48>}, {pipeline_mode = #tpu.pipeline_mode<synchronous>, transform_indices = @transform_17, window_bounds = array<i64: 1, 48>}, {pipeline_mode = #tpu.pipeline_mode<synchronous>, transform_indices = @transform_18, window_bounds = array<i64: 48, 64>}, {pipeline_mode = #tpu.pipeline_mode<synchronous>, transform_indices = @transform_19, window_bounds = array<i64: 1, 64>}, {pipeline_mode = #tpu.pipeline_mode<synchronous>, transform_indices = @transform_20, window_bounds = array<i64: 64, 80>}, {pipeline_mode = #tpu.pipeline_mode<synchronous>, transform_indices = @transform_21, window_bounds = array<i64: 1, 80>}, {pipeline_mode = #tpu.pipeline_mode<synchronous>, transform_indices = @transform_22, window_bounds = array<i64: 80, 96>}, {pipeline_mode = #tpu.pipeline_mode<synchronous>, transform_indices = @transform_23, window_bounds = array<i64: 1, 96>}, {pipeline_mode = #tpu.pipeline_mode<synchronous>, transform_indices = @transform_24, window_bounds = array<i64: 96, 128>}, {pipeline_mode = #tpu.pipeline_mode<synchronous>, transform_indices = @transform_25, window_bounds = array<i64: 1, 128>}, {transform_indices = @transform_26, window_bounds = array<i64: 128, 128>}, {transform_indices = @transform_27, window_bounds = array<i64: 128, 32>}]} {
    %c0 = arith.constant 0 : index
    %c0_0 = arith.constant 0 : index
    %0 = vector.load %arg1[%c0, %c0_0] : memref<128x128xf32, #tpu.memory_space<vmem>>, vector<128x128xf32>
    %1 = arith.truncf %0 : vector<128x128xf32> to vector<128x128xbf16>
    %c0_1 = arith.constant 0 : index
    %c0_2 = arith.constant 0 : index
    %2 = vector.load %arg3[%c0_1, %c0_2] : memref<128x96xbf16, #tpu.memory_space<vmem>>, vector<128x96xbf16>
    %cst = arith.constant dense<0.000000e+00> : vector<128x96xf32>
    %3 = tpu.matmul %1, %2, %cst {dimension_numbers = #tpu.dot_dimension_numbers<[1], [0], [0], [1], [0, 0, 1, 1], [], []>} : vector<128x128xbf16>, vector<128x96xbf16>, vector<128x96xf32> -> vector<128x96xf32>
    %c0_3 = arith.constant 0 : index
    %c0_4 = arith.constant 0 : index
    %4 = vector.load %arg4[%c0_3, %c0_4] : memref<1x96xf32, #tpu.memory_space<vmem>>, vector<1x96xf32>
    %5 = vector.broadcast %4 : vector<1x96xf32> to vector<128x96xf32>
    %6 = arith.addf %3, %5 : vector<128x96xf32>
    %cst_5 = arith.constant 0.000000e+00 : f32
    %7 = vector.broadcast %cst_5 : f32 to vector<128x96xf32>
    %8 = arith.maximumf %6, %7 : vector<128x96xf32>
    %9 = arith.truncf %8 : vector<128x96xf32> to vector<128x96xbf16>
    %c0_6 = arith.constant 0 : index
    %c0_7 = arith.constant 0 : index
    %10 = vector.load %arg5[%c0_6, %c0_7] : memref<96x80xbf16, #tpu.memory_space<vmem>>, vector<96x80xbf16>
    %cst_8 = arith.constant dense<0.000000e+00> : vector<128x80xf32>
    %11 = tpu.matmul %9, %10, %cst_8 {dimension_numbers = #tpu.dot_dimension_numbers<[1], [0], [0], [1], [0, 0, 1, 1], [], []>} : vector<128x96xbf16>, vector<96x80xbf16>, vector<128x80xf32> -> vector<128x80xf32>
    %c0_9 = arith.constant 0 : index
    %c0_10 = arith.constant 0 : index
    %12 = vector.load %arg6[%c0_9, %c0_10] : memref<1x80xf32, #tpu.memory_space<vmem>>, vector<1x80xf32>
    %13 = vector.broadcast %12 : vector<1x80xf32> to vector<128x80xf32>
    %14 = arith.addf %11, %13 : vector<128x80xf32>
    %cst_11 = arith.constant 0.000000e+00 : f32
    %15 = vector.broadcast %cst_11 : f32 to vector<128x80xf32>
    %16 = arith.maximumf %14, %15 : vector<128x80xf32>
    %17 = arith.truncf %16 : vector<128x80xf32> to vector<128x80xbf16>
    %c0_12 = arith.constant 0 : index
    %c0_13 = arith.constant 0 : index
    %18 = vector.load %arg7[%c0_12, %c0_13] : memref<80x64xbf16, #tpu.memory_space<vmem>>, vector<80x64xbf16>
    %cst_14 = arith.constant dense<0.000000e+00> : vector<128x64xf32>
    %19 = tpu.matmul %17, %18, %cst_14 {dimension_numbers = #tpu.dot_dimension_numbers<[1], [0], [0], [1], [0, 0, 1, 1], [], []>} : vector<128x80xbf16>, vector<80x64xbf16>, vector<128x64xf32> -> vector<128x64xf32>
    %c0_15 = arith.constant 0 : index
    %c0_16 = arith.constant 0 : index
    %20 = vector.load %arg8[%c0_15, %c0_16] : memref<1x64xf32, #tpu.memory_space<vmem>>, vector<1x64xf32>
    %21 = vector.broadcast %20 : vector<1x64xf32> to vector<128x64xf32>
    %22 = arith.addf %19, %21 : vector<128x64xf32>
    %cst_17 = arith.constant 0.000000e+00 : f32
    %23 = vector.broadcast %cst_17 : f32 to vector<128x64xf32>
    %24 = arith.maximumf %22, %23 : vector<128x64xf32>
    %25 = arith.truncf %24 : vector<128x64xf32> to vector<128x64xbf16>
    %c0_18 = arith.constant 0 : index
    %c0_19 = arith.constant 0 : index
    %26 = vector.load %arg9[%c0_18, %c0_19] : memref<64x48xbf16, #tpu.memory_space<vmem>>, vector<64x48xbf16>
    %cst_20 = arith.constant dense<0.000000e+00> : vector<128x48xf32>
    %27 = tpu.matmul %25, %26, %cst_20 {dimension_numbers = #tpu.dot_dimension_numbers<[1], [0], [0], [1], [0, 0, 1, 1], [], []>} : vector<128x64xbf16>, vector<64x48xbf16>, vector<128x48xf32> -> vector<128x48xf32>
    %c0_21 = arith.constant 0 : index
    %c0_22 = arith.constant 0 : index
    %28 = vector.load %arg10[%c0_21, %c0_22] : memref<1x48xf32, #tpu.memory_space<vmem>>, vector<1x48xf32>
    %29 = vector.broadcast %28 : vector<1x48xf32> to vector<128x48xf32>
    %30 = arith.addf %27, %29 : vector<128x48xf32>
    %cst_23 = arith.constant 0.000000e+00 : f32
    %31 = vector.broadcast %cst_23 : f32 to vector<128x48xf32>
    %32 = arith.maximumf %30, %31 : vector<128x48xf32>
    %33 = arith.truncf %32 : vector<128x48xf32> to vector<128x48xbf16>
    %c0_24 = arith.constant 0 : index
    %c0_25 = arith.constant 0 : index
    %34 = vector.load %arg11[%c0_24, %c0_25] : memref<48x32xbf16, #tpu.memory_space<vmem>>, vector<48x32xbf16>
    %cst_26 = arith.constant dense<0.000000e+00> : vector<128x32xf32>
    %35 = tpu.matmul %33, %34, %cst_26 {dimension_numbers = #tpu.dot_dimension_numbers<[1], [0], [0], [1], [0, 0, 1, 1], [], []>} : vector<128x48xbf16>, vector<48x32xbf16>, vector<128x32xf32> -> vector<128x32xf32>
    %c0_27 = arith.constant 0 : index
    %c0_28 = arith.constant 0 : index
    %36 = vector.load %arg12[%c0_27, %c0_28] : memref<1x32xf32, #tpu.memory_space<vmem>>, vector<1x32xf32>
    %37 = vector.broadcast %36 : vector<1x32xf32> to vector<128x32xf32>
    %38 = arith.addf %35, %37 : vector<128x32xf32>
    %cst_29 = arith.constant 0.000000e+00 : f32
    %39 = vector.broadcast %cst_29 : f32 to vector<128x32xf32>
    %40 = arith.maximumf %38, %39 : vector<128x32xf32>
    %41 = arith.truncf %40 : vector<128x32xf32> to vector<128x32xbf16>
    %c0_30 = arith.constant 0 : index
    %c0_31 = arith.constant 0 : index
    %42 = vector.load %arg13[%c0_30, %c0_31] : memref<32x32xbf16, #tpu.memory_space<vmem>>, vector<32x32xbf16>
    %cst_32 = arith.constant dense<0.000000e+00> : vector<128x32xf32>
    %43 = tpu.matmul %41, %42, %cst_32 {dimension_numbers = #tpu.dot_dimension_numbers<[1], [0], [0], [1], [0, 0, 1, 1], [], []>} : vector<128x32xbf16>, vector<32x32xbf16>, vector<128x32xf32> -> vector<128x32xf32>
    %c0_33 = arith.constant 0 : index
    %c0_34 = arith.constant 0 : index
    %44 = vector.load %arg14[%c0_33, %c0_34] : memref<1x32xf32, #tpu.memory_space<vmem>>, vector<1x32xf32>
    %45 = vector.broadcast %44 : vector<1x32xf32> to vector<128x32xf32>
    %46 = arith.addf %43, %45 : vector<128x32xf32>
    %47 = vector.extract_strided_slice %46 {offsets = [0, 0], sizes = [128, 16], strides = [1, 1]} : vector<128x32xf32> to vector<128x16xf32>
    %48 = vector.extract_strided_slice %46 {offsets = [0, 16], sizes = [128, 16], strides = [1, 1]} : vector<128x32xf32> to vector<128x16xf32>
    %c0_35 = arith.constant 0 : index
    %c0_36 = arith.constant 0 : index
    %49 = vector.load %arg2[%c0_35, %c0_36] : memref<128x16xf32, #tpu.memory_space<vmem>>, vector<128x16xf32>
    %50 = arith.mulf %48, %49 : vector<128x16xf32>
    %51 = arith.addf %47, %50 : vector<128x16xf32>
    %52 = arith.truncf %51 : vector<128x16xf32> to vector<128x16xbf16>
    %c0_37 = arith.constant 0 : index
    %c0_38 = arith.constant 0 : index
    %53 = vector.load %arg15[%c0_37, %c0_38] : memref<16x32xbf16, #tpu.memory_space<vmem>>, vector<16x32xbf16>
    %cst_39 = arith.constant dense<0.000000e+00> : vector<128x32xf32>
    %54 = tpu.matmul %52, %53, %cst_39 {dimension_numbers = #tpu.dot_dimension_numbers<[1], [0], [0], [1], [0, 0, 1, 1], [], []>} : vector<128x16xbf16>, vector<16x32xbf16>, vector<128x32xf32> -> vector<128x32xf32>
    %c0_40 = arith.constant 0 : index
    %c0_41 = arith.constant 0 : index
    %55 = vector.load %arg16[%c0_40, %c0_41] : memref<1x32xf32, #tpu.memory_space<vmem>>, vector<1x32xf32>
    %56 = vector.broadcast %55 : vector<1x32xf32> to vector<128x32xf32>
    %57 = arith.addf %54, %56 : vector<128x32xf32>
    %cst_42 = arith.constant 0.000000e+00 : f32
    %58 = vector.broadcast %cst_42 : f32 to vector<128x32xf32>
    %59 = arith.maximumf %57, %58 : vector<128x32xf32>
    %60 = arith.truncf %59 : vector<128x32xf32> to vector<128x32xbf16>
    %c0_43 = arith.constant 0 : index
    %c0_44 = arith.constant 0 : index
    %61 = vector.load %arg17[%c0_43, %c0_44] : memref<32x48xbf16, #tpu.memory_space<vmem>>, vector<32x48xbf16>
    %cst_45 = arith.constant dense<0.000000e+00> : vector<128x48xf32>
    %62 = tpu.matmul %60, %61, %cst_45 {dimension_numbers = #tpu.dot_dimension_numbers<[1], [0], [0], [1], [0, 0, 1, 1], [], []>} : vector<128x32xbf16>, vector<32x48xbf16>, vector<128x48xf32> -> vector<128x48xf32>
    %c0_46 = arith.constant 0 : index
    %c0_47 = arith.constant 0 : index
    %63 = vector.load %arg18[%c0_46, %c0_47] : memref<1x48xf32, #tpu.memory_space<vmem>>, vector<1x48xf32>
    %64 = vector.broadcast %63 : vector<1x48xf32> to vector<128x48xf32>
    %65 = arith.addf %62, %64 : vector<128x48xf32>
    %cst_48 = arith.constant 0.000000e+00 : f32
    %66 = vector.broadcast %cst_48 : f32 to vector<128x48xf32>
    %67 = arith.maximumf %65, %66 : vector<128x48xf32>
    %68 = arith.truncf %67 : vector<128x48xf32> to vector<128x48xbf16>
    %c0_49 = arith.constant 0 : index
    %c0_50 = arith.constant 0 : index
    %69 = vector.load %arg19[%c0_49, %c0_50] : memref<48x64xbf16, #tpu.memory_space<vmem>>, vector<48x64xbf16>
    %cst_51 = arith.constant dense<0.000000e+00> : vector<128x64xf32>
    %70 = tpu.matmul %68, %69, %cst_51 {dimension_numbers = #tpu.dot_dimension_numbers<[1], [0], [0], [1], [0, 0, 1, 1], [], []>} : vector<128x48xbf16>, vector<48x64xbf16>, vector<128x64xf32> -> vector<128x64xf32>
    %c0_52 = arith.constant 0 : index
    %c0_53 = arith.constant 0 : index
    %71 = vector.load %arg20[%c0_52, %c0_53] : memref<1x64xf32, #tpu.memory_space<vmem>>, vector<1x64xf32>
    %72 = vector.broadcast %71 : vector<1x64xf32> to vector<128x64xf32>
    %73 = arith.addf %70, %72 : vector<128x64xf32>
    %cst_54 = arith.constant 0.000000e+00 : f32
    %74 = vector.broadcast %cst_54 : f32 to vector<128x64xf32>
    %75 = arith.maximumf %73, %74 : vector<128x64xf32>
    %76 = arith.truncf %75 : vector<128x64xf32> to vector<128x64xbf16>
    %c0_55 = arith.constant 0 : index
    %c0_56 = arith.constant 0 : index
    %77 = vector.load %arg21[%c0_55, %c0_56] : memref<64x80xbf16, #tpu.memory_space<vmem>>, vector<64x80xbf16>
    %cst_57 = arith.constant dense<0.000000e+00> : vector<128x80xf32>
    %78 = tpu.matmul %76, %77, %cst_57 {dimension_numbers = #tpu.dot_dimension_numbers<[1], [0], [0], [1], [0, 0, 1, 1], [], []>} : vector<128x64xbf16>, vector<64x80xbf16>, vector<128x80xf32> -> vector<128x80xf32>
    %c0_58 = arith.constant 0 : index
    %c0_59 = arith.constant 0 : index
    %79 = vector.load %arg22[%c0_58, %c0_59] : memref<1x80xf32, #tpu.memory_space<vmem>>, vector<1x80xf32>
    %80 = vector.broadcast %79 : vector<1x80xf32> to vector<128x80xf32>
    %81 = arith.addf %78, %80 : vector<128x80xf32>
    %cst_60 = arith.constant 0.000000e+00 : f32
    %82 = vector.broadcast %cst_60 : f32 to vector<128x80xf32>
    %83 = arith.maximumf %81, %82 : vector<128x80xf32>
    %84 = arith.truncf %83 : vector<128x80xf32> to vector<128x80xbf16>
    %c0_61 = arith.constant 0 : index
    %c0_62 = arith.constant 0 : index
    %85 = vector.load %arg23[%c0_61, %c0_62] : memref<80x96xbf16, #tpu.memory_space<vmem>>, vector<80x96xbf16>
    %cst_63 = arith.constant dense<0.000000e+00> : vector<128x96xf32>
    %86 = tpu.matmul %84, %85, %cst_63 {dimension_numbers = #tpu.dot_dimension_numbers<[1], [0], [0], [1], [0, 0, 1, 1], [], []>} : vector<128x80xbf16>, vector<80x96xbf16>, vector<128x96xf32> -> vector<128x96xf32>
    %c0_64 = arith.constant 0 : index
    %c0_65 = arith.constant 0 : index
    %87 = vector.load %arg24[%c0_64, %c0_65] : memref<1x96xf32, #tpu.memory_space<vmem>>, vector<1x96xf32>
    %88 = vector.broadcast %87 : vector<1x96xf32> to vector<128x96xf32>
    %89 = arith.addf %86, %88 : vector<128x96xf32>
    %cst_66 = arith.constant 0.000000e+00 : f32
    %90 = vector.broadcast %cst_66 : f32 to vector<128x96xf32>
    %91 = arith.maximumf %89, %90 : vector<128x96xf32>
    %92 = arith.truncf %91 : vector<128x96xf32> to vector<128x96xbf16>
    %c0_67 = arith.constant 0 : index
    %c0_68 = arith.constant 0 : index
    %93 = vector.load %arg25[%c0_67, %c0_68] : memref<96x128xbf16, #tpu.memory_space<vmem>>, vector<96x128xbf16>
    %cst_69 = arith.constant dense<0.000000e+00> : vector<128x128xf32>
    %94 = tpu.matmul %92, %93, %cst_69 {dimension_numbers = #tpu.dot_dimension_numbers<[1], [0], [0], [1], [0, 0, 1, 1], [], []>} : vector<128x96xbf16>, vector<96x128xbf16>, vector<128x128xf32> -> vector<128x128xf32>
    %c0_70 = arith.constant 0 : index
    %c0_71 = arith.constant 0 : index
    %95 = vector.load %arg26[%c0_70, %c0_71] : memref<1x128xf32, #tpu.memory_space<vmem>>, vector<1x128xf32>
    %96 = vector.broadcast %95 : vector<1x128xf32> to vector<128x128xf32>
    %97 = arith.addf %94, %96 : vector<128x128xf32>
    %98 = arith.negf %97 : vector<128x128xf32>
    %99 = math.exp %98 : vector<128x128xf32>
    %cst_72 = arith.constant 1.000000e+00 : f32
    %100 = vector.broadcast %cst_72 : f32 to vector<128x128xf32>
    %101 = arith.addf %100, %99 : vector<128x128xf32>
    %102 = arith.divf %100, %101 : vector<128x128xf32>
    %c0_73 = arith.constant 0 : index
    %c0_74 = arith.constant 0 : index
    %103 = vector.load %arg27[%c0_73, %c0_74] : memref<128x128xf32, #tpu.memory_space<vmem>>, vector<128x128xf32>
    tpu.vector_store %arg27[%c0_73, %c0_74], %102 {strides = array<i32>} : memref<128x128xf32, #tpu.memory_space<vmem>>, vector<128x128xf32>,
    %c0_75 = arith.constant 0 : index
    %c0_76 = arith.constant 0 : index
    %104 = vector.load %arg28[%c0_75, %c0_76] : memref<128x32xf32, #tpu.memory_space<vmem>>, vector<128x32xf32>
    tpu.vector_store %arg28[%c0_75, %c0_76], %46 {strides = array<i32>} : memref<128x32xf32, #tpu.memory_space<vmem>>, vector<128x32xf32>,
    return
  }
  func.func @transform_0(%arg0: i32) -> (i32, i32) {
    %c0_i32 = arith.constant 0 : i32
    %c0_i32_0 = arith.constant 0 : i32
    return %arg0, %c0_i32 : i32, i32
  }
  func.func @transform_1(%arg0: i32) -> (i32, i32) {
    %c0_i32 = arith.constant 0 : i32
    %c0_i32_0 = arith.constant 0 : i32
    return %arg0, %c0_i32 : i32, i32
  }
  func.func @transform_2(%arg0: i32) -> (i32, i32) {
    %c0_i32 = arith.constant 0 : i32
    %c0_i32_0 = arith.constant 0 : i32
    %c0_i32_1 = arith.constant 0 : i32
    return %c0_i32, %c0_i32_0 : i32, i32
  }
  func.func @transform_3(%arg0: i32) -> (i32, i32) {
    %c0_i32 = arith.constant 0 : i32
    %c0_i32_0 = arith.constant 0 : i32
    %c0_i32_1 = arith.constant 0 : i32
    return %c0_i32, %c0_i32_0 : i32, i32
  }
  func.func @transform_4(%arg0: i32) -> (i32, i32) {
    %c0_i32 = arith.constant 0 : i32
    %c0_i32_0 = arith.constant 0 : i32
    %c0_i32_1 = arith.constant 0 : i32
    return %c0_i32, %c0_i32_0 : i32, i32
  }
  func.func @transform_5(%arg0: i32) -> (i32, i32) {
    %c0_i32 = arith.constant 0 : i32
    %c0_i32_0 = arith.constant 0 : i32
    %c0_i32_1 = arith.constant 0 : i32
    return %c0_i32, %c0_i32_0 : i32, i32
  }
  func.func @transform_6(%arg0: i32) -> (i32, i32) {
    %c0_i32 = arith.constant 0 : i32
    %c0_i32_0 = arith.constant 0 : i32
    %c0_i32_1 = arith.constant 0 : i32
    return %c0_i32, %c0_i32_0 : i32, i32
  }
  func.func @transform_7(%arg0: i32) -> (i32, i32) {
    %c0_i32 = arith.constant 0 : i32
    %c0_i32_0 = arith.constant 0 : i32
    %c0_i32_1 = arith.constant 0 : i32
    return %c0_i32, %c0_i32_0 : i32, i32
  }
  func.func @transform_8(%arg0: i32) -> (i32, i32) {
    %c0_i32 = arith.constant 0 : i32
    %c0_i32_0 = arith.constant 0 : i32
    %c0_i32_1 = arith.constant 0 : i32
    return %c0_i32, %c0_i32_0 : i32, i32
  }
  func.func @transform_9(%arg0: i32) -> (i32, i32) {
    %c0_i32 = arith.constant 0 : i32
    %c0_i32_0 = arith.constant 0 : i32
    %c0_i32_1 = arith.constant 0 : i32
    return %c0_i32, %c0_i32_0 : i32, i32
  }
  func.func @transform_10(%arg0: i32) -> (i32, i32) {
    %c0_i32 = arith.constant 0 : i32
    %c0_i32_0 = arith.constant 0 : i32
    %c0_i32_1 = arith.constant 0 : i32
    return %c0_i32, %c0_i32_0 : i32, i32
  }
  func.func @transform_11(%arg0: i32) -> (i32, i32) {
    %c0_i32 = arith.constant 0 : i32
    %c0_i32_0 = arith.constant 0 : i32
    %c0_i32_1 = arith.constant 0 : i32
    return %c0_i32, %c0_i32_0 : i32, i32
  }
  func.func @transform_12(%arg0: i32) -> (i32, i32) {
    %c0_i32 = arith.constant 0 : i32
    %c0_i32_0 = arith.constant 0 : i32
    %c0_i32_1 = arith.constant 0 : i32
    return %c0_i32, %c0_i32_0 : i32, i32
  }
  func.func @transform_13(%arg0: i32) -> (i32, i32) {
    %c0_i32 = arith.constant 0 : i32
    %c0_i32_0 = arith.constant 0 : i32
    %c0_i32_1 = arith.constant 0 : i32
    return %c0_i32, %c0_i32_0 : i32, i32
  }
  func.func @transform_14(%arg0: i32) -> (i32, i32) {
    %c0_i32 = arith.constant 0 : i32
    %c0_i32_0 = arith.constant 0 : i32
    %c0_i32_1 = arith.constant 0 : i32
    return %c0_i32, %c0_i32_0 : i32, i32
  }
  func.func @transform_15(%arg0: i32) -> (i32, i32) {
    %c0_i32 = arith.constant 0 : i32
    %c0_i32_0 = arith.constant 0 : i32
    %c0_i32_1 = arith.constant 0 : i32
    return %c0_i32, %c0_i32_0 : i32, i32
  }
  func.func @transform_16(%arg0: i32) -> (i32, i32) {
    %c0_i32 = arith.constant 0 : i32
    %c0_i32_0 = arith.constant 0 : i32
    %c0_i32_1 = arith.constant 0 : i32
    return %c0_i32, %c0_i32_0 : i32, i32
  }
  func.func @transform_17(%arg0: i32) -> (i32, i32) {
    %c0_i32 = arith.constant 0 : i32
    %c0_i32_0 = arith.constant 0 : i32
    %c0_i32_1 = arith.constant 0 : i32
    return %c0_i32, %c0_i32_0 : i32, i32
  }
  func.func @transform_18(%arg0: i32) -> (i32, i32) {
    %c0_i32 = arith.constant 0 : i32
    %c0_i32_0 = arith.constant 0 : i32
    %c0_i32_1 = arith.constant 0 : i32
    return %c0_i32, %c0_i32_0 : i32, i32
  }
  func.func @transform_19(%arg0: i32) -> (i32, i32) {
    %c0_i32 = arith.constant 0 : i32
    %c0_i32_0 = arith.constant 0 : i32
    %c0_i32_1 = arith.constant 0 : i32
    return %c0_i32, %c0_i32_0 : i32, i32
  }
  func.func @transform_20(%arg0: i32) -> (i32, i32) {
    %c0_i32 = arith.constant 0 : i32
    %c0_i32_0 = arith.constant 0 : i32
    %c0_i32_1 = arith.constant 0 : i32
    return %c0_i32, %c0_i32_0 : i32, i32
  }
  func.func @transform_21(%arg0: i32) -> (i32, i32) {
    %c0_i32 = arith.constant 0 : i32
    %c0_i32_0 = arith.constant 0 : i32
    %c0_i32_1 = arith.constant 0 : i32
    return %c0_i32, %c0_i32_0 : i32, i32
  }
  func.func @transform_22(%arg0: i32) -> (i32, i32) {
    %c0_i32 = arith.constant 0 : i32
    %c0_i32_0 = arith.constant 0 : i32
    %c0_i32_1 = arith.constant 0 : i32
    return %c0_i32, %c0_i32_0 : i32, i32
  }
  func.func @transform_23(%arg0: i32) -> (i32, i32) {
    %c0_i32 = arith.constant 0 : i32
    %c0_i32_0 = arith.constant 0 : i32
    %c0_i32_1 = arith.constant 0 : i32
    return %c0_i32, %c0_i32_0 : i32, i32
  }
  func.func @transform_24(%arg0: i32) -> (i32, i32) {
    %c0_i32 = arith.constant 0 : i32
    %c0_i32_0 = arith.constant 0 : i32
    %c0_i32_1 = arith.constant 0 : i32
    return %c0_i32, %c0_i32_0 : i32, i32
  }
  func.func @transform_25(%arg0: i32) -> (i32, i32) {
    %c0_i32 = arith.constant 0 : i32
    %c0_i32_0 = arith.constant 0 : i32
    %c0_i32_1 = arith.constant 0 : i32
    return %c0_i32, %c0_i32_0 : i32, i32
  }
  func.func @transform_26(%arg0: i32) -> (i32, i32) {
    %c0_i32 = arith.constant 0 : i32
    %c0_i32_0 = arith.constant 0 : i32
    return %arg0, %c0_i32 : i32, i32
  }
  func.func @transform_27(%arg0: i32) -> (i32, i32) {
    %c0_i32 = arith.constant 0 : i32
    %c0_i32_0 = arith.constant 0 : i32
    return %arg0, %c0_i32 : i32, i32
  }
}

</mosaic_0001>

<bundles_post_ra>
// kernel: tpu_custom_call.1
= control target key start
LH: loop header
LB: loop body
LE: loop exit
PB: predicated region body
PF: predicated region fallthrough
CT: control target
= control target key end

     0   :  { %s4543_s0 = inlined_call_operand.vmem [shape: f32[256,128], index: 0, kind: input, shape index: {}]   ;;  %s4544_s1 = inlined_call_operand.vmem [shape: f32[256,16], index: 1, kind: input, shape index: {}]   ;;  %s4545_s2 = inlined_call_operand.vmem [shape: bf16[128,96], index: 2, kind: input, shape index: {}]   ;;  %s4546_s3 = inlined_call_operand.vmem [shape: f32[1,96], index: 3, kind: input, shape index: {}]   ;;  %s4547_s4 = inlined_call_operand.vmem [shape: bf16[96,80], index: 4, kind: input, shape index: {}]   ;;  %s4548_s5 = inlined_call_operand.vmem [shape: f32[1,80], index: 5, kind: input, shape index: {}]   ;;  %s4549_s6 = inlined_call_operand.vmem [shape: bf16[80,64], index: 6, kind: input, shape index: {}]   ;;  %s4550_s7 = inlined_call_operand.vmem [shape: f32[1,64], index: 7, kind: input, shape index: {}]   ;;  %s4551_s8 = inlined_call_operand.vmem [shape: bf16[64,48], index: 8, kind: input, shape index: {}]   ;;  %s4552_s9 = inlined_call_operand.vmem [shape: f32[1,48], index: 9, kind: input, shape index: {}]   ;;  %s4553_s10 = inlined_call_operand.vmem [shape: bf16[48,32], index: 10, kind: input, shape index: {}]   ;;  %s4554_s11 = inlined_call_operand.vmem [shape: f32[1,32], index: 11, kind: input, shape index: {}]   ;;  %s4555_s12 = inlined_call_operand.vmem [shape: bf16[32,32], index: 12, kind: input, shape index: {}]   ;;  %s4556_s13 = inlined_call_operand.vmem [shape: f32[1,32], index: 13, kind: input, shape index: {}]   ;;  %s4557_s14 = inlined_call_operand.vmem [shape: bf16[16,32], index: 14, kind: input, shape index: {}]   ;;  %s4558_s15 = inlined_call_operand.vmem [shape: f32[1,32], index: 15, kind: input, shape index: {}]   ;;  %s4559_s16 = inlined_call_operand.vmem [shape: bf16[32,48], index: 16, kind: input, shape index: {}]   ;;  %s4560_s17 = inlined_call_operand.vmem [shape: f32[1,48], index: 17, kind: input, shape index: {}]   ;;  %s4561_s18 = inlined_call_operand.vmem [shape: bf16[48,64], index: 18, kind: input, shape index: {}]   ;;  %s4562_s19 = inlined_call_operand.vmem [shape: f32[1,64], index: 19, kind: input, shape index: {}]   ;;  %s4563_s20 = inlined_call_operand.vmem [shape: bf16[64,80], index: 20, kind: input, shape index: {}]   ;;  %s4564_s21 = inlined_call_operand.vmem [shape: f32[1,80], index: 21, kind: input, shape index: {}]   ;;  %s4565_s22 = inlined_call_operand.vmem [shape: bf16[80,96], index: 22, kind: input, shape index: {}]   ;;  %s4566_s23 = inlined_call_operand.vmem [shape: f32[1,96], index: 23, kind: input, shape index: {}]   ;;  %s4567_s24 = inlined_call_operand.vmem [shape: bf16[96,128], index: 24, kind: input, shape index: {}]   ;;  %s4568_s25 = inlined_call_operand.vmem [shape: f32[1,128], index: 25, kind: input, shape index: {}]   ;;  %s4569_s26 = inlined_call_operand.hbm [shape: f32[256,128], index: 26, kind: output, shape index: {0}]   ;;  %s4570_s27 = inlined_call_operand.vmem [shape: f32[256,32], index: 27, kind: output, shape index: {1}]  }
   0x1   :  { %4589 = sst [smem:[#allocation12_spill]] %s4543_s0 }
   0x2   :  { %4590 = sst [smem:[#allocation13_spill]] %s4544_s1 }
   0x3   :  { %4591 = sst [smem:[#allocation14_spill]] %s4545_s2 }
   0x4   :  { %4592 = sst [smem:[#allocation15_spill]] %s4546_s3 }
   0x5   :  { %4593 = sst [smem:[#allocation16_spill]] %s4547_s4 }
   0x6   :  { %4594 = sst [smem:[#allocation17_spill]] %s4548_s5 }
   0x7   :  { %4595 = sst [smem:[#allocation18_spill]] %s4549_s6 }
   0x8   :  { %4596 = sst [smem:[#allocation19_spill]] %s4550_s7 }
   0x9   :  { %4597 = sst [smem:[#allocation20_spill]] %s4551_s8 }
   0xa   :  { %4598 = sst [smem:[#allocation21_spill]] %s4552_s9 }
   0xb   :  { %4599 = sst [smem:[#allocation22_spill]] %s4553_s10 }
   0xc   :  { %4600 = sst [smem:[#allocation23_spill]] %s4554_s11 }
   0xd   :  { %4601 = sst [smem:[#allocation24_spill]] %s4555_s12 }
   0xe   :  { %4602 = sst [smem:[#allocation25_spill]] %s4556_s13 }
   0xf   :  { %33 = vsyncpa [#allocation3], 0 }
  0x10   :  { %35 = vsyncpa [#allocation3 + $0x1], 0  ;;  %s3756_s7 = smov 0   ;;  %s3758_s4 = smov 0  }
  0x11   :  { %s3760_s8 = smov 0   ;;  %s3762_s30 = smov 0  }
  0x12 LB: > { %4603 = sst [smem:[#allocation5_spill]] %s3598_s7  ;;  %s3777_s9 = sadd.s32 4294967295, %s3610_s30   ;;  %s3610_s30 = sphi %s3762_s30, %s4632_s30   ;;  %s3606_s8 = sphi %s3760_s8, %s4634_s8   ;;  %s3602_s4 = sphi %s3758_s4, %s4636_s4   ;;  %s3598_s7 = sphi %s3756_s7, %s4635_s7  }
  0x13   : > { %4604 = sst [smem:[#allocation6_spill]] %s3606_s8  ;;  %s3063_s5 = sadd.s32 4294967294, %s3610_s30  }
  0x14   : > { %4605 = sst [smem:[#allocation7_spill]] %s3610_s30  ;;  %s3781_s28 = sadd.s32 1, %s3610_s30  }
  0x15   : > { %4606 = sst [smem:[#allocation8_spill]] %s3781_s28  ;;  %s604_s0 = sadd.s32 1, %s3606_s8 }
  0x16   : > { %s601_s10 = ssub.s32 %s3610_s30, %s3781_s28  ;;  %p614_p0 = scmp.ne.s32.totalorder %s3606_s8, %s3602_s4 }
  0x17   : > { %p602_p1 = scmp.eq.s32.totalorder %s601_s10, 0  ;;  %p615_p2 = scmp.eq.s32.totalorder %s3777_s9, 1 }
  0x18   : > { %p620_p3 = scmp.ne.s32.totalorder %s3602_s4, %s3598_s7  ;;  %p621_p4 = scmp.eq.s32.totalorder %s3063_s5, 1 }
  0x19   : > { %s3792_s29 = scalar_select %p602_p1, %s3606_s8, %s604_s0  }
  0x1a   : > { %p3794_p5 = por %p615_p2, %p614_p0  ;;  %p3798_p6 = por %p621_p4, %p620_p3 }
  0x1b   : > { %4607 = sst [smem:[#allocation9_spill]] %s3792_s29  ;;  %p3066_p7 = scmp.ge.s32.totalorder %s3610_s30, 1 }
  0x1c   : > { %s4608_s1 = scalar_select %p3794_p5, 1, 0 }
  0x1d   : > { %s4610_s6 = scalar_select %p3798_p6, 1, 0 }
  0x1e   : > { %4609 = sst [smem:[#allocation10_spill]] %s4608_s1  ;;  %p755_p8 = scmp.lt.s32.totalorder %s3610_s30, 3 }
  0x1f   : > { %4611 = sst [smem:[#allocation11_spill]] %s4610_s6 }
  0x20   : > { %p756_p9 = pnand %p3066_p7, %p755_p8 }
  0x21   : > { %s4612_s3 = sld [smem:[#allocation14_spill]] (!%p756_p9)  ;;  %s3068_s8 = sshll.u32 (!%p756_p9), %s3777_s9, 4 }
  0x22   : > { %759 = sbr.rel (%p756_p9) target bundleno = 2183 (0x887), region = 124  ;;  %p838_p10 = scmp.lt.s32.totalorder (!%p756_p9), %s3068_s8, 31 }
  0x23   : > { %s4613_s30 = sld [smem:[#allocation12_spill]] (!%p756_p9) }
  0x24   : > { %s4614_s2 = sld [smem:[#allocation16_spill]] (!%p756_p9) }
  0x25   : > { %s4615_s28 = sld [smem:[#allocation15_spill]] (!%p756_p9) }
  0x26   : > { %s4619_s10 = sld [smem:[#allocation20_spill]] (!%p756_p9) }
  0x27   : > { %v3386_v0 = vld [vmem:[%s4612_s3 + $0x38] sm:$0xff]  ;;  %v3385_v1 = vld [vmem:[%s4612_s3 + $0x30] sm:$0xff]  ;;  %v3384_v2 = vld [vmem:[%s4612_s3 + $0x28] sm:$0xff]  ;;  %s4638_s8 = smov (!%p838_p10, %s3068_s8), 31  ;;  %vm1074_vm0 = vcmask 785408   ;;  %vm1216_vm1 = vcmask 654336  }
  0x28   : > { %949 = vmatpush.bf16.msra.mxu0 %v3386_v0  ;;  %v3383_v3 = vld [vmem:[%s4612_s3 + $0x20] sm:$0xff]  ;;  %v3382_v4 = vld [vmem:[%s4612_s3 + $0x18] sm:$0xff]  ;;  %v3381_v5 = vld [vmem:[%s4612_s3 + $0x10] sm:$0xff]  ;;  %s3823_s29 = sshll.u32 %s4638_s8, 3  ;;  %s4616_s8 = sld [smem:[#allocation18_spill]]  ;;  %vm1350_vm2 = vcmask 523264  }
  0x29   : > { %v3380_v6 = vld [vmem:[%s4612_s3 + $0x8] sm:$0xff]  ;;  %s3832_s1 = scalar_lea.vmem %s4613_s30, %s3823_s29  ;;  %v3379_v7 = vld [vmem:[%s4612_s3] sm:$0xff]  ;;  %s4618_s30 = sld [smem:[#allocation17_spill]]  ;;  %vm1476_vm3 = vcmask 392192   ;;  %vm1594_vm4 = vcmask 261120   ;;  %vm1864_vm5 = vcmask 130048  }
  0x2a   : > { %v857_v8 = vld [vmem:[%s3832_s1] sm:$0xff]  ;;  %v858_v9 = vld [vmem:[%s3832_s1 + $0x8] sm:$0xff]  ;;  %v859_v11 = vld [vmem:[%s3832_s1 + $0x10] sm:$0xff]  ;;  %s4623_s6 = sld [smem:[#allocation21_spill]] }
  0x2b   : > { %v873_v10 = vpack.c.bf16 %v858_v9, %v857_v8  ;;  %v860_v12 = vld [vmem:[%s3832_s1 + $0x18] sm:$0xff]  ;;  %v861_v14 = vld [vmem:[%s3832_s1 + $0x20] sm:$0xff]  ;;  %v862_v15 = vld [vmem:[%s3832_s1 + $0x28] sm:$0xff]  ;;  %s4624_s12 = sld [smem:[#allocation24_spill]] }
  0x2c   : > { %950 = vmatpush.bf16.msra.mxu0 %v3385_v1  ;;  %v874_v13 = vpack.c.bf16 %v860_v12, %v859_v11  ;;  %v875_v16 = vpack.c.bf16 %v862_v15, %v861_v14  ;;  %v863_v17 = vld [vmem:[%s3832_s1 + $0x30] sm:$0xff]  ;;  %v864_v18 = vld [vmem:[%s3832_s1 + $0x38] sm:$0xff]  ;;  %v865_v20 = vld [vmem:[%s3832_s1 + $0x40] sm:$0xff]  ;;  %s4626_s5 = sld [smem:[#allocation23_spill]] }
  0x2d   : > { %v876_v19 = vpack.c.bf16 %v864_v18, %v863_v17  ;;  %v866_v21 = vld [vmem:[%s3832_s1 + $0x48] sm:$0xff]  ;;  %v867_v23 = vld [vmem:[%s3832_s1 + $0x50] sm:$0xff]  ;;  %v868_v24 = vld [vmem:[%s3832_s1 + $0x58] sm:$0xff]  ;;  %s4627_s13 = sld [smem:[#allocation25_spill]] }
  0x2e   : > { %v877_v22 = vpack.c.bf16 %v866_v21, %v865_v20  ;;  %v878_v25 = vpack.c.bf16 %v868_v24, %v867_v23  ;;  %v3392_v26 = vld [vmem:[%s4614_s2 + $0x28] sm:$0xff]  ;;  %v3391_v27 = vld [vmem:[%s4614_s2 + $0x20] sm:$0xff]  ;;  %v3390_v30 = vld [vmem:[%s4614_s2 + $0x18] sm:$0xff]  ;;  %s4617_s11 = smov %s4616_s8 }
  0x2f   : > { %1101 = vmatpush.bf16.msra.mxu1 %v3392_v26  ;;  %v869_v28 = vld [vmem:[%s3832_s1 + $0x60] sm:$0xff]  ;;  %v870_v29 = vld [vmem:[%s3832_s1 + $0x68] sm:$0xff]  ;;  %v3389_v32 = vld [vmem:[%s4614_s2 + $0x10] sm:$0xff] }
  0x30   : > { %951 = vmatpush.bf16.msra.mxu0 %v3384_v2  ;;  %v879_v31 = vpack.c.bf16 %v870_v29, %v869_v28  ;;  %v3388_v33 = vld [vmem:[%s4614_s2 + $0x8] sm:$0xff]  ;;  %v3387_v34 = vld [vmem:[%s4614_s2] sm:$0xff]  ;;  %v871_v35 = vld [vmem:[%s3832_s1 + $0x70] sm:$0xff] }
  0x31   : > { %v872_v36 = vld [vmem:[%s3832_s1 + $0x78] sm:$0xff]  ;;  %v3874_v39 = vld [vmem:[%s4615_s28] ss:$0 sm:$0xff]  ;;  %v3395_v26 = vld [vmem:[%s4617_s11 + $0x10] sm:$0xff]  ;;  %s4620_s28 = sld [smem:[#allocation19_spill]] }
  0x32   : > { %v880_v37 = vpack.c.bf16 %v872_v36, %v871_v35  ;;  %v3397_v17 = vld [vmem:[%s4616_s8 + $0x20] sm:$0xff]  ;;  %v3396_v23 = vld [vmem:[%s4617_s11 + $0x18] sm:$0xff]  ;;  %v3394_v28 = vld [vmem:[%s4617_s11 + $0x8] sm:$0xff]  ;;  %s4621_s8 = sld [smem:[#allocation22_spill]] }
  0x33   : > { %1102 = vmatpush.bf16.msra.mxu1 %v3391_v27  ;;  %1244 = vmatpush.bf16.msra.mxu2 %v3397_v17  ;;  %s4625_s1 = sld [smem:[#allocation13_spill]] }
  0x34   : > { %952 = vmatpush.bf16.msra.mxu0 %v3383_v3 }
  0x37   : > { %1103 = vmatpush.bf16.msra.mxu1 %v3390_v30  ;;  %1245 = vmatpush.bf16.msra.mxu2 %v3396_v23  ;;  %v3393_v30 = vld [vmem:[%s4617_s11] sm:$0xff]  ;;  %v3401_v23 = vld [vmem:[%s4619_s10 + $0x18] sm:$0xff] }
  0x38   : > { %953 = vmatpush.bf16.msra.mxu0 %v3382_v4  ;;  %1379 = vmatpush.bf16.msra.mxu3 %v3401_v23  ;;  %s4622_s2 = smov %s4621_s8 }
  0x3b   : > { %1104 = vmatpush.bf16.msra.mxu1 %v3389_v32  ;;  %1246 = vmatpush.bf16.msra.mxu2 %v3395_v26 }
  0x3c   : > { %954 = vmatpush.bf16.msra.mxu0 %v3381_v5 }
  0x3f   : > { %1105 = vmatpush.bf16.msra.mxu1 %v3388_v33  ;;  %1247 = vmatpush.bf16.msra.mxu2 %v3394_v28 }
  0x40   : > { %955 = vmatpush.bf16.msra.mxu0 %v3380_v6 }
  0x43   : > { %1106 = vmatpush.bf16.msra.mxu1 %v3387_v34  ;;  %1248 = vmatpush.bf16.msra.mxu2 %v3393_v30 }
  0x44   : > { %956 = vmatpush.bf16.msra.mxu0 %v3379_v7 }
  0x47   : > { %957 = vmatmul.bf16.vlgmr.msra.gmra.mxu0 %v873_v10 }
  0x57   : > { %962 = vmatmul.bf16.gmra.mxu0 %v874_v13 }
  0x67   : > { %967 = vmatmul.bf16.gmra.mxu0 %v875_v16 }
  0x77   : > { %972 = vmatmul.bf16.gmra.mxu0 %v876_v19 }
  0x87   : > { %977 = vmatmul.bf16.gmra.mxu0 %v877_v22 }
  0x97   : > { %982 = vmatmul.bf16.gmra.mxu0 %v878_v25 }
  0xa7   : > { %987 = vmatmul.bf16.gmra.mxu0 %v879_v31 }
  0xb7   : > { %992 = vmatmul.bf16.gmra.mxu0 %v880_v37  ;;  %v3918_v37 = vld [vmem:[%s4618_s30] ss:$0 sm:$0xff]  ;;  %s4087_s30 = scalar_lea.vmem %s4570_s27, %s3823_s29 }
  0xc4   : > { %v958_v38 = vpop.f32.mrf.mxu0 }
  0xc5   : > { %v959_v40 = vadd.f32 %v3874_v39, %v958_v38 }
  0xc7   : > { %v998_v43 = vmax.f32 %v959_v40, 0.0 }
  0xcc   : > { %v960_v41 = vpop.f32.mrf.mxu0 }
  0xcd   : > { %v961_v42 = vadd.f32 %v3874_v39, %v960_v41 }
  0xcf   : > { %v999_v44 = vmax.f32 %v961_v42, 0.0 }
  0xd1   : > { %v1014_v45 = vpack.c.bf16 %v999_v44, %v998_v43 }
  0xd3   : > { %3130 = vmatmul.msk.bf16.vlgmr.msra.gmra.mxu1 %vm1074_vm0, %v1014_v45 }
  0xd4   : > { %v963_v46 = vpop.f32.mrf.mxu0 }
  0xd5   : > { %v964_v47 = vadd.f32 %v3874_v39, %v963_v46 }
  0xd7   : > { %v1000_v49 = vmax.f32 %v964_v47, 0.0 }
  0xdc   : > { %v965_v48 = vpop.f32.mrf.mxu0 }
  0xdd   : > { %v966_v50 = vadd.f32 %v3874_v39, %v965_v48 }
  0xdf   : > { %v1001_v51 = vmax.f32 %v966_v50, 0.0 }
  0xe1   : > { %v1015_v52 = vpack.c.bf16 %v1001_v51, %v1000_v49 }
  0xe3   : > { %3131 = vmatmul.msk.bf16.gmra.mxu1 %vm1074_vm0, %v1015_v52 }
  0xe4   : > { %v968_v53 = vpop.f32.mrf.mxu0 }
  0xe5   : > { %v969_v54 = vadd.f32 %v3874_v39, %v968_v53 }
  0xe7   : > { %v1002_v56 = vmax.f32 %v969_v54, 0.0 }
  0xec   : > { %v970_v55 = vpop.f32.mrf.mxu0 }
  0xed   : > { %v971_v57 = vadd.f32 %v3874_v39, %v970_v55 }
  0xef   : > { %v1003_v58 = vmax.f32 %v971_v57, 0.0 }
  0xf1   : > { %v1016_v59 = vpack.c.bf16 %v1003_v58, %v1002_v56 }
  0xf3   : > { %3132 = vmatmul.msk.bf16.gmra.mxu1 %vm1074_vm0, %v1016_v59 }
  0xf4   : > { %v973_v60 = vpop.f32.mrf.mxu0 }
  0xf5   : > { %v974_v61 = vadd.f32 %v3874_v39, %v973_v60 }
  0xf7   : > { %v1004_v63 = vmax.f32 %v974_v61, 0.0 }
  0xfc   : > { %v975_v62 = vpop.f32.mrf.mxu0 }
  0xfd   : > { %v976_v0 = vadd.f32 %v3874_v39, %v975_v62 }
  0xff   : > { %v1005_v1 = vmax.f32 %v976_v0, 0.0 }
 0x101   : > { %v1017_v2 = vpack.c.bf16 %v1005_v1, %v1004_v63 }
 0x103   : > { %3133 = vmatmul.msk.bf16.gmra.mxu1 %vm1074_vm0, %v1017_v2 }
 0x104   : > { %v978_v3 = vpop.f32.mrf.mxu0 }
 0x105   : > { %v979_v4 = vadd.f32 %v3874_v39, %v978_v3 }
 0x107   : > { %v1006_v6 = vmax.f32 %v979_v4, 0.0 }
 0x10c   : > { %v980_v5 = vpop.f32.mrf.mxu0 }
 0x10d   : > { %v981_v7 = vadd.f32 %v3874_v39, %v980_v5 }
 0x10f   : > { %v1007_v8 = vmax.f32 %v981_v7, 0.0 }
 0x111   : > { %v1018_v9 = vpack.c.bf16 %v1007_v8, %v1006_v6 }
 0x113   : > { %3134 = vmatmul.msk.bf16.gmra.mxu1 %vm1074_vm0, %v1018_v9 }
 0x114   : > { %v983_v10 = vpop.f32.mrf.mxu0 }
 0x115   : > { %v984_v11 = vadd.f32 %v3874_v39, %v983_v10 }
 0x117   : > { %v1008_v13 = vmax.f32 %v984_v11, 0.0 }
 0x11c   : > { %v985_v12 = vpop.f32.mrf.mxu0 }
 0x11d   : > { %v986_v14 = vadd.f32 %v3874_v39, %v985_v12 }
 0x11f   : > { %v1009_v15 = vmax.f32 %v986_v14, 0.0 }
 0x121   : > { %v1019_v16 = vpack.c.bf16 %v1009_v15, %v1008_v13 }
 0x123   : > { %3135 = vmatmul.msk.bf16.gmra.mxu1 %vm1074_vm0, %v1019_v16 }
 0x124   : > { %v988_v18 = vpop.f32.mrf.mxu0 }
 0x125   : > { %v989_v19 = vadd.f32 %v3874_v39, %v988_v18 }
 0x127   : > { %v1010_v21 = vmax.f32 %v989_v19, 0.0 }
 0x12c   : > { %v990_v20 = vpop.f32.mrf.mxu0 }
 0x12d   : > { %v991_v22 = vadd.f32 %v3874_v39, %v990_v20 }
 0x12f   : > { %v1011_v24 = vmax.f32 %v991_v22, 0.0 }
 0x131   : > { %v1020_v25 = vpack.c.bf16 %v1011_v24, %v1010_v21  ;;  %v3400_v24 = vld [vmem:[%s4619_s10 + $0x10] sm:$0xff] }
 0x132   : > { %1380 = vmatpush.bf16.msra.mxu3 %v3400_v24 }
 0x133   : > { %3136 = vmatmul.msk.bf16.gmra.mxu1 %vm1074_vm0, %v1020_v25 }
 0x134   : > { %v993_v27 = vpop.f32.mrf.mxu0 }
 0x135   : > { %v994_v29 = vadd.f32 %v3874_v39, %v993_v27  ;;  %v3399_v27 = vld [vmem:[%s4619_s10 + $0x8] sm:$0xff] }
 0x136   : > { %1381 = vmatpush.bf16.msra.mxu3 %v3399_v27 }
 0x137   : > { %v1012_v32 = vmax.f32 %v994_v29, 0.0 }
 0x13c   : > { %v995_v31 = vpop.f32.mrf.mxu0 }
 0x13d   : > { %v996_v33 = vadd.f32 %v3874_v39, %v995_v31  ;;  %v3398_v31 = vld [vmem:[%s4619_s10] sm:$0xff] }
 0x13e   : > { %1382 = vmatpush.bf16.msra.mxu3 %v3398_v31  ;;  %v3406_v31 = vld [vmem:[%s4624_s12 + $0x8] sm:$0xff] }
 0x13f   : > { %v1013_v34 = vmax.f32 %v996_v33, 0.0  ;;  %1625 = vmatpush.bf16.msrb.mxu2 %v3406_v31 }
 0x141   : > { %v1021_v35 = vpack.c.bf16 %v1013_v34, %v1012_v32  ;;  %v3959_v34 = vld [vmem:[%s4620_s28] ss:$0 sm:$0xff] }
 0x143   : > { %3137 = vmatmul.msk.bf16.gmra.mxu1 %vm1074_vm0, %v1021_v35  ;;  %v3404_v35 = vld [vmem:[%s4621_s8 + $0x10] sm:$0xff]  ;;  %s3612_s8 = smov 16  }
 0x144   : > { %1506 = vmatpush.bf16.msrb.mxu3 %v3404_v35 }
 0x150   : > { %v1108_v36 = vpop.f32.mrf.mxu1 }
 0x151   : > { %v1109_v38 = vadd.f32 %v3918_v37, %v1108_v36 }
 0x153   : > { %v1148_v42 = vmax.f32 %v1109_v38, 0.0 }
 0x158   : > { %v1110_v40 = vpop.f32.mrf.mxu1 }
 0x159   : > { %v1111_v41 = vadd.f32 %v3918_v37, %v1110_v40 }
 0x15b   : > { %v1149_v43 = vmax.f32 %v1111_v41, 0.0 }
 0x15d   : > { %v1164_v44 = vpack.c.bf16 %v1149_v43, %v1148_v42 }
 0x15f   : > { %3158 = vmatmul.msk.bf16.vlgmr.msra.gmra.mxu2 %vm1216_vm1, %v1164_v44 }
 0x160   : > { %v1113_v39 = vpop.f32.mrf.mxu1 }
 0x161   : > { %v1114_v45 = vadd.f32 %v3918_v37, %v1113_v39 }
 0x163   : > { %v1150_v47 = vmax.f32 %v1114_v45, 0.0 }
 0x168   : > { %v1115_v46 = vpop.f32.mrf.mxu1 }
 0x169   : > { %v1116_v48 = vadd.f32 %v3918_v37, %v1115_v46 }
 0x16b   : > { %v1151_v49 = vmax.f32 %v1116_v48, 0.0 }
 0x16d   : > { %v1165_v50 = vpack.c.bf16 %v1151_v49, %v1150_v47 }
 0x16f   : > { %3159 = vmatmul.msk.bf16.gmra.mxu2 %vm1216_vm1, %v1165_v50 }
 0x170   : > { %v1118_v51 = vpop.f32.mrf.mxu1 }
 0x171   : > { %v1119_v52 = vadd.f32 %v3918_v37, %v1118_v51 }
 0x173   : > { %v1152_v54 = vmax.f32 %v1119_v52, 0.0 }
 0x178   : > { %v1120_v53 = vpop.f32.mrf.mxu1 }
 0x179   : > { %v1121_v55 = vadd.f32 %v3918_v37, %v1120_v53 }
 0x17b   : > { %v1153_v56 = vmax.f32 %v1121_v55, 0.0  ;;  %v3403_v55 = vld [vmem:[%s4622_s2 + $0x8] sm:$0xff] }
 0x17c   : > { %1507 = vmatpush.bf16.msrb.mxu3 %v3403_v55 }
 0x17d   : > { %v1166_v57 = vpack.c.bf16 %v1153_v56, %v1152_v54 }
 0x17f   : > { %3160 = vmatmul.msk.bf16.gmra.mxu2 %vm1216_vm1, %v1166_v57 }
 0x180   : > { %v1123_v58 = vpop.f32.mrf.mxu1 }
 0x181   : > { %v1124_v59 = vadd.f32 %v3918_v37, %v1123_v58 }
 0x183   : > { %v1154_v61 = vmax.f32 %v1124_v59, 0.0 }
 0x188   : > { %v1125_v60 = vpop.f32.mrf.mxu1 }
 0x189   : > { %v1126_v62 = vadd.f32 %v3918_v37, %v1125_v60 }
 0x18b   : > { %v1155_v63 = vmax.f32 %v1126_v62, 0.0 }
 0x18d   : > { %v1167_v0 = vpack.c.bf16 %v1155_v63, %v1154_v61 }
 0x18f   : > { %3161 = vmatmul.msk.bf16.gmra.mxu2 %vm1216_vm1, %v1167_v0 }
 0x190   : > { %v1128_v1 = vpop.f32.mrf.mxu1 }
 0x191   : > { %v1129_v2 = vadd.f32 %v3918_v37, %v1128_v1 }
 0x193   : > { %v1156_v4 = vmax.f32 %v1129_v2, 0.0 }
 0x198   : > { %v1130_v3 = vpop.f32.mrf.mxu1 }
 0x199   : > { %v1131_v5 = vadd.f32 %v3918_v37, %v1130_v3 }
 0x19b   : > { %v1157_v6 = vmax.f32 %v1131_v5, 0.0 }
 0x19d   : > { %v1168_v7 = vpack.c.bf16 %v1157_v6, %v1156_v4 }
 0x19f   : > { %3162 = vmatmul.msk.bf16.gmra.mxu2 %vm1216_vm1, %v1168_v7 }
 0x1a0   : > { %v1133_v8 = vpop.f32.mrf.mxu1 }
 0x1a1   : > { %v1134_v9 = vadd.f32 %v3918_v37, %v1133_v8  ;;  %v3402_v8 = vld [vmem:[%s4622_s2] sm:$0xff]  ;;  %s3568_s2 = scalar_lea.hbm %s4569_s26, 256 }
 0x1a2   : > { %1508 = vmatpush.bf16.msrb.mxu3 %v3402_v8 }
 0x1a3   : > { %v1158_v11 = vmax.f32 %v1134_v9, 0.0 }
 0x1a8   : > { %v1135_v10 = vpop.f32.mrf.mxu1 }
 0x1a9   : > { %v1136_v12 = vadd.f32 %v3918_v37, %v1135_v10 }
 0x1ab   : > { %v1159_v13 = vmax.f32 %v1136_v12, 0.0 }
 0x1ad   : > { %v1169_v14 = vpack.c.bf16 %v1159_v13, %v1158_v11 }
 0x1af   : > { %3163 = vmatmul.msk.bf16.gmra.mxu2 %vm1216_vm1, %v1169_v14 }
 0x1b0   : > { %v1138_v15 = vpop.f32.mrf.mxu1 }
 0x1b1   : > { %v1139_v16 = vadd.f32 %v3918_v37, %v1138_v15 }
 0x1b3   : > { %v1160_v18 = vmax.f32 %v1139_v16, 0.0 }
 0x1b8   : > { %v1140_v17 = vpop.f32.mrf.mxu1 }
 0x1b9   : > { %v1141_v19 = vadd.f32 %v3918_v37, %v1140_v17 }
 0x1bb   : > { %v1161_v20 = vmax.f32 %v1141_v19, 0.0 }
 0x1bd   : > { %v1170_v21 = vpack.c.bf16 %v1161_v20, %v1160_v18 }
 0x1bf   : > { %3164 = vmatmul.msk.bf16.gmra.mxu2 %vm1216_vm1, %v1170_v21 }
 0x1c0   : > { %v1143_v22 = vpop.f32.mrf.mxu1 }
 0x1c1   : > { %v1144_v25 = vadd.f32 %v3918_v37, %v1143_v22 }
 0x1c3   : > { %v1162_v28 = vmax.f32 %v1144_v25, 0.0 }
 0x1c8   : > { %v1145_v26 = vpop.f32.mrf.mxu1 }
 0x1c9   : > { %v1146_v29 = vadd.f32 %v3918_v37, %v1145_v26 }
 0x1cb   : > { %v1163_v30 = vmax.f32 %v1146_v29, 0.0 }
 0x1cd   : > { %v1171_v32 = vpack.c.bf16 %v1163_v30, %v1162_v28  ;;  %v3997_v30 = vld [vmem:[%s4623_s6] ss:$0 sm:$0xff]  ;;  %s4033_s6 = scalar_lea.vmem %s4625_s1, %s3823_s29  ;;  %s827_s29 = sand.u32 1, %s3602_s4  }
 0x1ce   : > { %s3067_s0 = sshll.u32 %s827_s29, 7 }
 0x1cf   : > { %3165 = vmatmul.msk.bf16.gmra.mxu2 %vm1216_vm1, %v1171_v32 }
 0x1e2   : > { %v1250_v33 = vpop.f32.mrf.mxu2 }
 0x1e3   : > { %v1251_v36 = vadd.f32 %v3959_v34, %v1250_v33 }
 0x1e5   : > { %v1290_v40 = vmax.f32 %v1251_v36, 0.0 }
 0x1ea   : > { %v1252_v37 = vpop.f32.mrf.mxu2 }
 0x1eb   : > { %v1253_v38 = vadd.f32 %v3959_v34, %v1252_v37 }
 0x1ed   : > { %v1291_v41 = vmax.f32 %v1253_v38, 0.0 }
 0x1ef   : > { %v1306_v42 = vpack.c.bf16 %v1291_v41, %v1290_v40 }
 0x1f1   : > { %3182 = vmatmul.msk.bf16.vlgmr.msra.gmra.mxu3 %vm1350_vm2, %v1306_v42 }
 0x1f2   : > { %v1255_v43 = vpop.f32.mrf.mxu2 }
 0x1f3   : > { %v1256_v44 = vadd.f32 %v3959_v34, %v1255_v43 }
 0x1f5   : > { %v1292_v46 = vmax.f32 %v1256_v44, 0.0 }
 0x1fa   : > { %v1257_v39 = vpop.f32.mrf.mxu2 }
 0x1fb   : > { %v1258_v45 = vadd.f32 %v3959_v34, %v1257_v39 }
 0x1fd   : > { %v1293_v47 = vmax.f32 %v1258_v45, 0.0 }
 0x1ff   : > { %v1307_v48 = vpack.c.bf16 %v1293_v47, %v1292_v46 }
 0x201   : > { %3183 = vmatmul.msk.bf16.gmra.mxu3 %vm1350_vm2, %v1307_v48 }
 0x202   : > { %v1260_v49 = vpop.f32.mrf.mxu2 }
 0x203   : > { %v1261_v50 = vadd.f32 %v3959_v34, %v1260_v49 }
 0x205   : > { %v1294_v53 = vmax.f32 %v1261_v50, 0.0 }
 0x20a   : > { %v1262_v51 = vpop.f32.mrf.mxu2 }
 0x20b   : > { %v1263_v52 = vadd.f32 %v3959_v34, %v1262_v51 }
 0x20d   : > { %v1295_v54 = vmax.f32 %v1263_v52, 0.0 }
 0x20f   : > { %v1308_v56 = vpack.c.bf16 %v1295_v54, %v1294_v53 }
 0x211   : > { %3184 = vmatmul.msk.bf16.gmra.mxu3 %vm1350_vm2, %v1308_v56 }
 0x212   : > { %v1265_v57 = vpop.f32.mrf.mxu2 }
 0x213   : > { %v1266_v58 = vadd.f32 %v3959_v34, %v1265_v57 }
 0x215   : > { %v1296_v61 = vmax.f32 %v1266_v58, 0.0 }
 0x21a   : > { %v1267_v59 = vpop.f32.mrf.mxu2 }
 0x21b   : > { %v1268_v60 = vadd.f32 %v3959_v34, %v1267_v59 }
 0x21d   : > { %v1297_v62 = vmax.f32 %v1268_v60, 0.0  ;;  %v3405_v60 = vld [vmem:[%s4624_s12] sm:$0xff] }
 0x21e   : > { %1626 = vmatpush.bf16.msrb.mxu2 %v3405_v60 }
 0x21f   : > { %v1309_v63 = vpack.c.bf16 %v1297_v62, %v1296_v61 }
 0x221   : > { %3185 = vmatmul.msk.bf16.gmra.mxu3 %vm1350_vm2, %v1309_v63 }
 0x222   : > { %v1270_v0 = vpop.f32.mrf.mxu2 }
 0x223   : > { %v1271_v1 = vadd.f32 %v3959_v34, %v1270_v0 }
 0x225   : > { %v1298_v4 = vmax.f32 %v1271_v1, 0.0 }
 0x22a   : > { %v1272_v2 = vpop.f32.mrf.mxu2 }
 0x22b   : > { %v1273_v3 = vadd.f32 %v3959_v34, %v1272_v2 }
 0x22d   : > { %v1299_v5 = vmax.f32 %v1273_v3, 0.0 }
 0x22f   : > { %v1310_v6 = vpack.c.bf16 %v1299_v5, %v1298_v4 }
 0x231   : > { %3186 = vmatmul.msk.bf16.gmra.mxu3 %vm1350_vm2, %v1310_v6 }
 0x232   : > { %v1275_v7 = vpop.f32.mrf.mxu2 }
 0x233   : > { %v1276_v9 = vadd.f32 %v3959_v34, %v1275_v7 }
 0x235   : > { %v1300_v12 = vmax.f32 %v1276_v9, 0.0 }
 0x23a   : > { %v1277_v10 = vpop.f32.mrf.mxu2 }
 0x23b   : > { %v1278_v11 = vadd.f32 %v3959_v34, %v1277_v10 }
 0x23d   : > { %v1301_v13 = vmax.f32 %v1278_v11, 0.0 }
 0x23f   : > { %v1311_v14 = vpack.c.bf16 %v1301_v13, %v1300_v12 }
 0x241   : > { %3187 = vmatmul.msk.bf16.gmra.mxu3 %vm1350_vm2, %v1311_v14 }
 0x242   : > { %v1280_v15 = vpop.f32.mrf.mxu2 }
 0x243   : > { %v1281_v16 = vadd.f32 %v3959_v34, %v1280_v15 }
 0x245   : > { %v1302_v19 = vmax.f32 %v1281_v16, 0.0 }
 0x24a   : > { %v1282_v17 = vpop.f32.mrf.mxu2 }
 0x24b   : > { %v1283_v18 = vadd.f32 %v3959_v34, %v1282_v17 }
 0x24d   : > { %v1303_v20 = vmax.f32 %v1283_v18, 0.0 }
 0x24f   : > { %v1312_v21 = vpack.c.bf16 %v1303_v20, %v1302_v19 }
 0x251   : > { %3188 = vmatmul.msk.bf16.gmra.mxu3 %vm1350_vm2, %v1312_v21 }
 0x252   : > { %v1285_v22 = vpop.f32.mrf.mxu2 }
 0x253   : > { %v1286_v23 = vadd.f32 %v3959_v34, %v1285_v22 }
 0x255   : > { %v1304_v26 = vmax.f32 %v1286_v23, 0.0 }
 0x25a   : > { %v1287_v24 = vpop.f32.mrf.mxu2 }
 0x25b   : > { %v1288_v25 = vadd.f32 %v3959_v34, %v1287_v24 }
 0x25d   : > { %v1305_v27 = vmax.f32 %v1288_v25, 0.0  ;;  %v1668_v25 = vld [vmem:[%s4033_s6] sm:$0xff] }
 0x25e   : > { %1700 = vrot.lane.b32.xlu0 %v1668_v25, %s3612_s8 }
 0x25f   : > { %v1313_v28 = vpack.c.bf16 %v1305_v27, %v1304_v26  ;;  %v4040_v26 = vld [vmem:[%s4626_s5] ss:$0 sm:$0xff]  ;;  %s3613_s5 = smov 112  }
 0x261   : > { %3189 = vmatmul.msk.bf16.gmra.mxu3 %vm1350_vm2, %v1313_v28 }
 0x274   : > { %v1384_v29 = vpop.f32.mrf.mxu3 }
 0x275   : > { %v1385_v32 = vadd.f32 %v3997_v30, %v1384_v29 }
 0x277   : > { %v1424_v35 = vmax.f32 %v1385_v32, 0.0 }
 0x27c   : > { %v1386_v33 = vpop.f32.mrf.mxu3 }
 0x27d   : > { %v1387_v34 = vadd.f32 %v3997_v30, %v1386_v33 }
 0x27f   : > { %v1425_v36 = vmax.f32 %v1387_v34, 0.0 }
 0x281   : > { %v1440_v37 = vpack.c.bf16 %v1425_v36, %v1424_v35  ;;  %v1670_v35 = vld [vmem:[%s4033_s6 + $0x10] sm:$0xff] }
 0x282   : > { %1704 = vrot.lane.b32.xlu1 %v1670_v35, %s3612_s8 }
 0x283   : > { %3202 = vmatmul.msk.bf16.vlgmr.msrb.gmra.mxu3 %vm1476_vm3, %v1440_v37 }
 0x284   : > { %v1389_v38 = vpop.f32.mrf.mxu3 }
 0x285   : > { %v1390_v40 = vadd.f32 %v3997_v30, %v1389_v38 }
 0x287   : > { %v1426_v43 = vmax.f32 %v1390_v40, 0.0  ;;  %v1671_v40 = vld [vmem:[%s4033_s6 + $0x18] sm:$0xff] }
 0x28a   : > { %1706 = vrot.lane.b32.xlu1 %v1671_v40, %s3612_s8 }
 0x28c   : > { %v1391_v41 = vpop.f32.mrf.mxu3 }
 0x28d   : > { %v1392_v42 = vadd.f32 %v3997_v30, %v1391_v41 }
 0x28f   : > { %v1427_v44 = vmax.f32 %v1392_v42, 0.0 }
 0x291   : > { %v1441_v39 = vpack.c.bf16 %v1427_v44, %v1426_v43 }
 0x293   : > { %3203 = vmatmul.msk.bf16.gmra.mxu3 %vm1476_vm3, %v1441_v39 }
 0x294   : > { %v1394_v45 = vpop.f32.mrf.mxu3 }
 0x295   : > { %v1395_v46 = vadd.f32 %v3997_v30, %v1394_v45 }
 0x297   : > { %v1428_v49 = vmax.f32 %v1395_v46, 0.0 }
 0x29c   : > { %v1396_v47 = vpop.f32.mrf.mxu3 }
 0x29d   : > { %v1397_v48 = vadd.f32 %v3997_v30, %v1396_v47 }
 0x29f   : > { %v1429_v50 = vmax.f32 %v1397_v48, 0.0 }
 0x2a1   : > { %v1442_v51 = vpack.c.bf16 %v1429_v50, %v1428_v49 }
 0x2a3   : > { %3204 = vmatmul.msk.bf16.gmra.mxu3 %vm1476_vm3, %v1442_v51 }
 0x2a4   : > { %v1399_v52 = vpop.f32.mrf.mxu3 }
 0x2a5   : > { %v1400_v53 = vadd.f32 %v3997_v30, %v1399_v52 }
 0x2a7   : > { %v1430_v56 = vmax.f32 %v1400_v53, 0.0 }
 0x2ac   : > { %v1401_v54 = vpop.f32.mrf.mxu3 }
 0x2ad   : > { %v1402_v55 = vadd.f32 %v3997_v30, %v1401_v54  ;;  %v1672_v54 = vld [vmem:[%s4033_s6 + $0x20] sm:$0xff] }
 0x2ae   : > { %1708 = vrot.lane.b32.xlu2 %v1672_v54, %s3612_s8 }
 0x2af   : > { %v1431_v57 = vmax.f32 %v1402_v55, 0.0 }
 0x2b1   : > { %v1443_v58 = vpack.c.bf16 %v1431_v57, %v1430_v56 }
 0x2b3   : > { %3205 = vmatmul.msk.bf16.gmra.mxu3 %vm1476_vm3, %v1443_v58 }
 0x2b4   : > { %v1404_v59 = vpop.f32.mrf.mxu3 }
 0x2b5   : > { %v1405_v61 = vadd.f32 %v3997_v30, %v1404_v59  ;;  %v1673_v59 = vld [vmem:[%s4033_s6 + $0x28] sm:$0xff] }
 0x2b6   : > { %1710 = vrot.lane.b32.xlu2 %v1673_v59, %s3612_s8 }
 0x2b7   : > { %v1432_v0 = vmax.f32 %v1405_v61, 0.0 }
 0x2bc   : > { %v1406_v62 = vpop.f32.mrf.mxu3 }
 0x2bd   : > { %v1407_v63 = vadd.f32 %v3997_v30, %v1406_v62 }
 0x2bf   : > { %v1433_v1 = vmax.f32 %v1407_v63, 0.0  ;;  %v1674_v63 = vld [vmem:[%s4033_s6 + $0x30] sm:$0xff] }
 0x2c0   : > { %1712 = vrot.lane.b32.xlu2 %v1674_v63, %s3612_s8 }
 0x2c1   : > { %v1444_v2 = vpack.c.bf16 %v1433_v1, %v1432_v0 }
 0x2c3   : > { %3206 = vmatmul.msk.bf16.gmra.mxu3 %vm1476_vm3, %v1444_v2 }
 0x2c4   : > { %v1409_v3 = vpop.f32.mrf.mxu3 }
 0x2c5   : > { %v1410_v4 = vadd.f32 %v3997_v30, %v1409_v3 }
 0x2c7   : > { %v1434_v7 = vmax.f32 %v1410_v4, 0.0 }
 0x2cc   : > { %v1411_v5 = vpop.f32.mrf.mxu3 }
 0x2cd   : > { %v1412_v6 = vadd.f32 %v3997_v30, %v1411_v5 }
 0x2cf   : > { %v1435_v8 = vmax.f32 %v1412_v6, 0.0 }
 0x2d0   : > { %v1701_v25 = vpop.permute.xlu0 %1700 }
 0x2d1   : > { %v1445_v9 = vpack.c.bf16 %v1435_v8, %v1434_v7 }
 0x2d3   : > { %3207 = vmatmul.msk.bf16.gmra.mxu3 %vm1476_vm3, %v1445_v9 }
 0x2d4   : > { %v1414_v10 = vpop.f32.mrf.mxu3 }
 0x2d5   : > { %v1415_v11 = vadd.f32 %v3997_v30, %v1414_v10 }
 0x2d7   : > { %v1436_v14 = vmax.f32 %v1415_v11, 0.0 }
 0x2dc   : > { %v1416_v12 = vpop.f32.mrf.mxu3 }
 0x2dd   : > { %v1417_v13 = vadd.f32 %v3997_v30, %v1416_v12 }
 0x2df   : > { %v1437_v15 = vmax.f32 %v1417_v13, 0.0 }
 0x2e1   : > { %v1446_v16 = vpack.c.bf16 %v1437_v15, %v1436_v14 }
 0x2e3   : > { %3208 = vmatmul.msk.bf16.gmra.mxu3 %vm1476_vm3, %v1446_v16 }
 0x2e4   : > { %v1419_v17 = vpop.f32.mrf.mxu3 }
 0x2e5   : > { %v1420_v18 = vadd.f32 %v3997_v30, %v1419_v17 }
 0x2e7   : > { %v1438_v21 = vmax.f32 %v1420_v18, 0.0 }
 0x2ec   : > { %v1421_v19 = vpop.f32.mrf.mxu3 }
 0x2ed   : > { %v1422_v20 = vadd.f32 %v3997_v30, %v1421_v19  ;;  %v1669_v30 = vld [vmem:[%s4033_s6 + $0x8] sm:$0xff] }
 0x2ee   : > { %1702 = vrot.lane.b32.xlu0 %v1669_v30, %s3612_s8 }
 0x2ef   : > { %v1439_v22 = vmax.f32 %v1422_v20, 0.0 }
 0x2f1   : > { %v1447_v23 = vpack.c.bf16 %v1439_v22, %v1438_v21 }
 0x2f3   : > { %3209 = vmatmul.msk.bf16.gmra.mxu3 %vm1476_vm3, %v1447_v23 }
 0x306   : > { %v1510_v24 = vpop.f32.mrf.mxu3 }
 0x307   : > { %v1511_v27 = vadd.f32 %v4040_v26, %v1510_v24  ;;  %v4081_v24 = vld [vmem:[%s4627_s13] ss:$0 sm:$0xff] }
 0x309   : > { %v1550_v31 = vmax.f32 %v1511_v27, 0.0 }
 0x30e   : > { %v1512_v28 = vpop.f32.mrf.mxu3 }
 0x30f   : > { %v1513_v29 = vadd.f32 %v4040_v26, %v1512_v28 }
 0x311   : > { %v1551_v32 = vmax.f32 %v1513_v29, 0.0 }
 0x313   : > { %v1566_v33 = vpack.c.bf16 %v1551_v32, %v1550_v31  ;;  %v1675_v32 = vld [vmem:[%s4033_s6 + $0x38] sm:$0xff] }
 0x315   : > { %3218 = vmatmul.msk.bf16.vlgmr.msrb.gmra.mxu2 %vm1594_vm4, %v1566_v33 }
 0x316   : > { %v1515_v34 = vpop.f32.mrf.mxu3 }
 0x317   : > { %v1516_v36 = vadd.f32 %v4040_v26, %v1515_v34  ;;  %v1705_v34 = vpop.permute.xlu1 %1704 }
 0x319   : > { %v1552_v41 = vmax.f32 %v1516_v36, 0.0 }
 0x31e   : > { %v1517_v37 = vpop.f32.mrf.mxu3 }
 0x31f   : > { %v1518_v38 = vadd.f32 %v4040_v26, %v1517_v37  ;;  %v1676_v37 = vld [vmem:[%s4033_s6 + $0x40] sm:$0xff] }
 0x321   : > { %v1553_v42 = vmax.f32 %v1518_v38, 0.0 }
 0x323   : > { %v1567_v43 = vpack.c.bf16 %v1553_v42, %v1552_v41  ;;  %v1707_v41 = vpop.permute.xlu1 %1706 }
 0x325   : > { %3219 = vmatmul.msk.bf16.gmra.mxu2 %vm1594_vm4, %v1567_v43  ;;  %v1677_v43 = vld [vmem:[%s4033_s6 + $0x48] sm:$0xff] }
 0x326   : > { %v1520_v44 = vpop.f32.mrf.mxu3 }
 0x327   : > { %v1521_v39 = vadd.f32 %v4040_v26, %v1520_v44 }
 0x329   : > { %v1554_v47 = vmax.f32 %v1521_v39, 0.0  ;;  %v1709_v39 = vpop.permute.xlu2 %1708 }
 0x32e   : > { %v1522_v45 = vpop.f32.mrf.mxu3 }
 0x32f   : > { %v1523_v46 = vadd.f32 %v4040_v26, %v1522_v45 }
 0x331   : > { %v1555_v48 = vmax.f32 %v1523_v46, 0.0 }
 0x333   : > { %v1568_v49 = vpack.c.bf16 %v1555_v48, %v1554_v47  ;;  %v1678_v47 = vld [vmem:[%s4033_s6 + $0x50] sm:$0xff] }
 0x335   : > { %3220 = vmatmul.msk.bf16.gmra.mxu2 %vm1594_vm4, %v1568_v49  ;;  %v1711_v49 = vpop.permute.xlu2 %1710 }
 0x336   : > { %v1525_v50 = vpop.f32.mrf.mxu3 }
 0x337   : > { %v1526_v51 = vadd.f32 %v4040_v26, %v1525_v50 }
 0x339   : > { %v1556_v55 = vmax.f32 %v1526_v51, 0.0 }
 0x33e   : > { %v1527_v52 = vpop.f32.mrf.mxu3 }
 0x33f   : > { %v1528_v53 = vadd.f32 %v4040_v26, %v1527_v52  ;;  %v1679_v52 = vld [vmem:[%s4033_s6 + $0x58] sm:$0xff] }
 0x341   : > { %v1557_v56 = vmax.f32 %v1528_v53, 0.0 }
 0x343   : > { %v1569_v57 = vpack.c.bf16 %v1557_v56, %v1556_v55  ;;  %v1713_v55 = vpop.permute.xlu2 %1712 }
 0x345   : > { %3221 = vmatmul.msk.bf16.gmra.mxu2 %vm1594_vm4, %v1569_v57  ;;  %v1680_v57 = vld [vmem:[%s4033_s6 + $0x60] sm:$0xff] }
 0x346   : > { %v1530_v58 = vpop.f32.mrf.mxu3 }
 0x347   : > { %v1531_v60 = vadd.f32 %v4040_v26, %v1530_v58 }
 0x349   : > { %v1558_v0 = vmax.f32 %v1531_v60, 0.0 }
 0x34e   : > { %v1532_v61 = vpop.f32.mrf.mxu3 }
 0x34f   : > { %v1533_v62 = vadd.f32 %v4040_v26, %v1532_v61  ;;  %v1681_v61 = vld [vmem:[%s4033_s6 + $0x68] sm:$0xff] }
 0x351   : > { %v1559_v1 = vmax.f32 %v1533_v62, 0.0 }
 0x353   : > { %v1570_v2 = vpack.c.bf16 %v1559_v1, %v1558_v0  ;;  %v1682_v0 = vld [vmem:[%s4033_s6 + $0x70] sm:$0xff] }
 0x355   : > { %3222 = vmatmul.msk.bf16.gmra.mxu2 %vm1594_vm4, %v1570_v2 }
 0x356   : > { %v1535_v3 = vpop.f32.mrf.mxu3 }
 0x357   : > { %v1536_v4 = vadd.f32 %v4040_v26, %v1535_v3 }
 0x359   : > { %v1560_v7 = vmax.f32 %v1536_v4, 0.0 }
 0x35e   : > { %v1537_v5 = vpop.f32.mrf.mxu3 }
 0x35f   : > { %v1538_v6 = vadd.f32 %v4040_v26, %v1537_v5 }
 0x360   : > { %v1703_v30 = vpop.permute.xlu0 %1702 }
 0x361   : > { %v1561_v8 = vmax.f32 %v1538_v6, 0.0 }
 0x363   : > { %v1571_v9 = vpack.c.bf16 %v1561_v8, %v1560_v7  ;;  %v3407_v8 = vld [vmem:[%s4557_s14] sm:$0xff] }
 0x364   : > { %1896 = vmatpush.bf16.msrb.mxu1 %v3407_v8 }
 0x365   : > { %3223 = vmatmul.msk.bf16.gmra.mxu2 %vm1594_vm4, %v1571_v9 }
 0x366   : > { %v1540_v10 = vpop.f32.mrf.mxu3 }
 0x367   : > { %v1541_v11 = vadd.f32 %v4040_v26, %v1540_v10 }
 0x369   : > { %v1562_v14 = vmax.f32 %v1541_v11, 0.0 }
 0x36e   : > { %v1542_v12 = vpop.f32.mrf.mxu3 }
 0x36f   : > { %v1543_v13 = vadd.f32 %v4040_v26, %v1542_v12 }
 0x371   : > { %v1563_v15 = vmax.f32 %v1543_v13, 0.0 }
 0x373   : > { %v1572_v16 = vpack.c.bf16 %v1563_v15, %v1562_v14 }
 0x375   : > { %3224 = vmatmul.msk.bf16.gmra.mxu2 %vm1594_vm4, %v1572_v16 }
 0x376   : > { %v1545_v17 = vpop.f32.mrf.mxu3 }
 0x377   : > { %v1546_v18 = vadd.f32 %v4040_v26, %v1545_v17 }
 0x379   : > { %v1564_v21 = vmax.f32 %v1546_v18, 0.0 }
 0x37e   : > { %v1547_v19 = vpop.f32.mrf.mxu3 }
 0x37f   : > { %v1548_v20 = vadd.f32 %v4040_v26, %v1547_v19 }
 0x381   : > { %v1565_v22 = vmax.f32 %v1548_v20, 0.0 }
 0x383   : > { %v1573_v23 = vpack.c.bf16 %v1565_v22, %v1564_v21 }
 0x385   : > { %3225 = vmatmul.msk.bf16.gmra.mxu2 %vm1594_vm4, %v1573_v23 }
 0x398   : > { %v1628_v26 = vpop.f32.mrf.mxu2 }
 0x399   : > { %v4090_v27 = vadd.f32 %v4081_v24, %v1628_v26 }
 0x39b   : > { %2923 = vst.msk [vmem:[%s4087_s30] sm:$0xff] %vm1594_vm4, %v4090_v27  ;;  %v1748_v28 = vmul.f32 %v1701_v25, %v4090_v27 }
 0x39d   : > { %1780 = vrot.lane.b32.xlu0 %v1748_v28, %s3613_s5 }
 0x3a0   : > { %v1630_v29 = vpop.f32.mrf.mxu2 }
 0x3a1   : > { %v4098_v31 = vadd.f32 %v4081_v24, %v1630_v29 }
 0x3a3   : > { %2924 = vst.msk [vmem:[%s4087_s30 + $0x8] sm:$0xff] %vm1594_vm4, %v4098_v31  ;;  %v1749_v33 = vmul.f32 %v1703_v30, %v4098_v31 }
 0x3a5   : > { %1782 = vrot.lane.b32.xlu1 %v1749_v33, %s3613_s5  ;;  %1714 = vrot.lane.b32.xlu0 %v1675_v32, %s3612_s8 }
 0x3a8   : > { %v1633_v35 = vpop.f32.mrf.mxu2 }
 0x3a9   : > { %v4108_v36 = vadd.f32 %v4081_v24, %v1633_v35 }
 0x3ab   : > { %2925 = vst.msk [vmem:[%s4087_s30 + $0x10] sm:$0xff] %vm1594_vm4, %v4108_v36  ;;  %v1750_v38 = vmul.f32 %v1705_v34, %v4108_v36  ;;  %v1683_v34 = vld [vmem:[%s4033_s6 + $0x78] sm:$0xff]  ;;  %s4473_s6 = scalar_lea.vmem [#allocation2], %s3067_s0  ;;  %s2940_s0 = scalar_lea.sflag [#allocation3], %s827_s29 }
 0x3ad   : > { %1784 = vrot.lane.b32.xlu1 %v1750_v38, %s3613_s5  ;;  %1716 = vrot.lane.b32.xlu0 %v1676_v37, %s3612_s8 }
 0x3b0   : > { %v1635_v40 = vpop.f32.mrf.mxu2 }
 0x3b1   : > { %v4118_v42 = vadd.f32 %v4081_v24, %v1635_v40 }
 0x3b3   : > { %2926 = vst.msk [vmem:[%s4087_s30 + $0x18] sm:$0xff] %vm1594_vm4, %v4118_v42  ;;  %v1751_v44 = vmul.f32 %v1707_v41, %v4118_v42 }
 0x3b5   : > { %1786 = vrot.lane.b32.xlu2 %v1751_v44, %s3613_s5  ;;  %1718 = vrot.lane.b32.xlu1 %v1677_v43, %s3612_s8 }
 0x3b8   : > { %v1638_v45 = vpop.f32.mrf.mxu2 }
 0x3b9   : > { %v4128_v46 = vadd.f32 %v4081_v24, %v1638_v45 }
 0x3bb   : > { %2927 = vst.msk [vmem:[%s4087_s30 + $0x20] sm:$0xff] %vm1594_vm4, %v4128_v46  ;;  %v1752_v48 = vmul.f32 %v1709_v39, %v4128_v46 }
 0x3bd   : > { %1788 = vrot.lane.b32.xlu2 %v1752_v48, %s3613_s5  ;;  %1720 = vrot.lane.b32.xlu1 %v1678_v47, %s3612_s8 }
 0x3c0   : > { %v1640_v50 = vpop.f32.mrf.mxu2 }
 0x3c1   : > { %v4138_v51 = vadd.f32 %v4081_v24, %v1640_v50  ;;  %v3408_v50 = vld [vmem:[%s4559_s16] sm:$0xff] }
 0x3c3   : > { %2928 = vst.msk [vmem:[%s4087_s30 + $0x28] sm:$0xff] %vm1594_vm4, %v4138_v51  ;;  %v1753_v53 = vmul.f32 %v1711_v49, %v4138_v51 }
 0x3c5   : > { %1722 = vrot.lane.b32.xlu2 %v1679_v52, %s3612_s8  ;;  %1790 = vrot.lane.b32.xlu0 %v1753_v53, %s3613_s5 }
 0x3c8   : > { %v1643_v54 = vpop.f32.mrf.mxu2 }
 0x3c9   : > { %v4148_v56 = vadd.f32 %v4081_v24, %v1643_v54 }
 0x3cb   : > { %2929 = vst.msk [vmem:[%s4087_s30 + $0x30] sm:$0xff] %vm1594_vm4, %v4148_v56  ;;  %v1754_v58 = vmul.f32 %v1713_v55, %v4148_v56 }
 0x3cd   : > { %1724 = vrot.lane.b32.xlu2 %v1680_v57, %s3612_s8  ;;  %1792 = vrot.lane.b32.xlu0 %v1754_v58, %s3613_s5 }
 0x3d0   : > { %v1645_v59 = vpop.f32.mrf.mxu2 }
 0x3d1   : > { %v4158_v60 = vadd.f32 %v4081_v24, %v1645_v59 }
 0x3d3   : > { %2930 = vst.msk [vmem:[%s4087_s30 + $0x38] sm:$0xff] %vm1594_vm4, %v4158_v60 }
 0x3d5   : > { %1726 = vrot.lane.b32.xlu0 %v1681_v61, %s3612_s8  ;;  %v4258_v61 = vld [vmem:[%s4558_s15] ss:$0 sm:$0xff] }
 0x3d8   : > { %v1648_v62 = vpop.f32.mrf.mxu2 }
 0x3d9   : > { %v4166_v63 = vadd.f32 %v4081_v24, %v1648_v62 }
 0x3db   : > { %2931 = vst.msk [vmem:[%s4087_s30 + $0x40] sm:$0xff] %vm1594_vm4, %v4166_v63 }
 0x3dd   : > { %1728 = vrot.lane.b32.xlu0 %v1682_v0, %s3612_s8 }
 0x3e0   : > { %v1650_v1 = vpop.f32.mrf.mxu2 }
 0x3e1   : > { %v4174_v2 = vadd.f32 %v4081_v24, %v1650_v1 }
 0x3e3   : > { %2932 = vst.msk [vmem:[%s4087_s30 + $0x48] sm:$0xff] %vm1594_vm4, %v4174_v2 }
 0x3e8   : > { %v1653_v3 = vpop.f32.mrf.mxu2 }
 0x3e9   : > { %v4180_v4 = vadd.f32 %v4081_v24, %v1653_v3 }
 0x3eb   : > { %2933 = vst.msk [vmem:[%s4087_s30 + $0x50] sm:$0xff] %vm1594_vm4, %v4180_v4 }
 0x3f0   : > { %v1655_v5 = vpop.f32.mrf.mxu2 }
 0x3f1   : > { %v4186_v6 = vadd.f32 %v4081_v24, %v1655_v5 }
 0x3f3   : > { %2934 = vst.msk [vmem:[%s4087_s30 + $0x58] sm:$0xff] %vm1594_vm4, %v4186_v6 }
 0x3f8   : > { %v1658_v7 = vpop.f32.mrf.mxu2 }
 0x3f9   : > { %v4195_v9 = vadd.f32 %v4081_v24, %v1658_v7 }
 0x3fb   : > { %2935 = vst.msk [vmem:[%s4087_s30 + $0x60] sm:$0xff] %vm1594_vm4, %v4195_v9 }
 0x400   : > { %v1660_v10 = vpop.f32.mrf.mxu2 }
 0x401   : > { %v4201_v11 = vadd.f32 %v4081_v24, %v1660_v10 }
 0x403   : > { %2936 = vst.msk [vmem:[%s4087_s30 + $0x68] sm:$0xff] %vm1594_vm4, %v4201_v11 }
 0x408   : > { %v1663_v12 = vpop.f32.mrf.mxu2 }
 0x409   : > { %v4207_v13 = vadd.f32 %v4081_v24, %v1663_v12 }
 0x40b   : > { %2937 = vst.msk [vmem:[%s4087_s30 + $0x70] sm:$0xff] %vm1594_vm4, %v4207_v13 }
 0x40f   : > { %v1787_v14 = vpop.permute.xlu2 %1786  ;;  %v1781_v15 = vpop.permute.xlu0 %1780 }
 0x410   : > { %v1665_v16 = vpop.f32.mrf.mxu2  ;;  %v1828_v20 = vadd.f32 %v1781_v15, %v4090_v27  ;;  %v1831_v32 = vadd.f32 %v1787_v14, %v4118_v42 }
 0x411   : > { %v4213_v17 = vadd.f32 %v4081_v24, %v1665_v16 }
 0x413   : > { %2938 = vst.msk [vmem:[%s4087_s30 + $0x78] sm:$0xff] %vm1594_vm4, %v4213_v17 }
 0x417   : > { %v1789_v18 = vpop.permute.xlu2 %1788  ;;  %v1783_v19 = vpop.permute.xlu1 %1782 }
 0x418   : > { %v1829_v21 = vadd.f32 %v1783_v19, %v4098_v31  ;;  %v1715_v22 = vpop.permute.xlu0 %1714  ;;  %v1832_v42 = vadd.f32 %v1789_v18, %v4128_v46  ;;  %v3409_v46 = vld [vmem:[%s4559_s16 + $0x8] sm:$0xff] }
 0x419   : > { %v1755_v23 = vmul.f32 %v1715_v22, %v4158_v60  ;;  %2012 = vmatpush.bf16.msrb.mxu0 %v3409_v46 }
 0x41a   : > { %v1844_v25 = vpack.c.bf16 %v1829_v21, %v1828_v20 }
 0x41b   : > { %1794 = vrot.lane.b32.xlu1 %v1755_v23, %s3613_s5 }
 0x41c   : > { %3230 = vmatmul.msk.bf16.vlgmr.msrb.gmra.mxu1 %vm1864_vm5, %v1844_v25 }
 0x41d   : > { %2013 = vmatpush.bf16.msrb.mxu0 %v3408_v50 }
 0x41f   : > { %v1723_v24 = vpop.permute.xlu2 %1722  ;;  %v1785_v26 = vpop.permute.xlu1 %1784 }
 0x420   : > { %v1759_v28 = vmul.f32 %v1723_v24, %v4186_v6  ;;  %v1717_v29 = vpop.permute.xlu0 %1716  ;;  %v1830_v27 = vadd.f32 %v1785_v26, %v4108_v36 }
 0x421   : > { %v1756_v30 = vmul.f32 %v1717_v29, %v4166_v63 }
 0x422   : > { %1802 = vrot.lane.b32.xlu0 %v1759_v28, %s3613_s5  ;;  %v1845_v35 = vpack.c.bf16 %v1831_v32, %v1830_v27 }
 0x423   : > { %1796 = vrot.lane.b32.xlu1 %v1756_v30, %s3613_s5 }
 0x427   : > { %v1719_v31 = vpop.permute.xlu1 %1718  ;;  %v1725_v37 = vpop.permute.xlu2 %1724 }
 0x428   : > { %v1757_v33 = vmul.f32 %v1719_v31, %v4174_v2  ;;  %v1760_v41 = vmul.f32 %v1725_v37, %v4195_v9  ;;  %v3410_v37 = vld [vmem:[%s4561_s18] sm:$0xff] }
 0x42a   : > { %1798 = vrot.lane.b32.xlu2 %v1757_v33, %s3613_s5 }
 0x42b   : > { %1730 = vrot.lane.b32.xlu1 %v1683_v34, %s3612_s8  ;;  %v3412_v34 = vld [vmem:[%s4561_s18 + $0x10] sm:$0xff]  ;;  %s3428_s8 = sshll.u32 %s3777_s9, 7  ;;  %s2957_s9 = sshll.u32 %s4473_s6, 4  ;;  %s2958_s9 = int_to_ptr.vmem [resolvable:$true] %s2957_s9 }
 0x42c   : > { %3231 = vmatmul.msk.bf16.gmra.mxu1 %vm1864_vm5, %v1845_v35  ;;  %2136 = vmatpush.bf16.msra.mxu3 %v3412_v34  ;;  %s2956_s7 = scalar_lea.hbm %s4569_s26, %s3428_s8 }
 0x42d   : > { %s2959_s30 = sshll.u32 %s2956_s7, 4  ;;  %s2960_s30 = int_to_ptr.hbm [resolvable:$true] %s2959_s30 }
 0x42e   : > { %s3562_s8 = sshra.s32 %s2960_s30, 4  ;;  %s3563_s8 = int_to_ptr.hbm [resolvable:$true] %s3562_s8 }
 0x42f   : > { %v1721_v38 = vpop.permute.xlu1 %1720  ;;  %s3564_s28 = scalar_lea.hbm %s3563_s8, 128  ;;  %p3569_p0 = scmp.lt.s32.totalorder %s3563_s8, %s4569_s26 }
 0x430   : > { %v1758_v40 = vmul.f32 %v1721_v38, %v4180_v4  ;;  %p3565_p11 = scmp.ne.s32.totalorder %s3563_s8, %s3564_s28  ;;  %p3570_p1 = scmp.lt.s32.totalorder %s3568_s2, %s3564_s28 }
 0x432   : > { %1800 = vrot.lane.b32.xlu2 %v1758_v40, %s3613_s5  ;;  %p3566_p12 = pnand %p3565_p11, %p3794_p5  ;;  %p3571_p2 = por %p3570_p1, %p3569_p0 }
 0x433   : > { %1804 = vrot.lane.b32.xlu1 %v1760_v41, %s3613_s5 }
 0x434   : > { %p3567_p13 = pneg %p3566_p12 }
 0x436   : > { %p3572_p3 = pnand %p3571_p2, %p3567_p13 }
 0x437   : > { %v1791_v36 = vpop.permute.xlu0 %1790 }
 0x438   : > { %v1833_v43 = vadd.f32 %v1791_v36, %v4138_v51 }
 0x43a   : > { %v1846_v44 = vpack.c.bf16 %v1833_v43, %v1832_v42 }
 0x43c   : > { %3232 = vmatmul.msk.bf16.gmra.mxu1 %vm1864_vm5, %v1846_v44 }
 0x43f   : > { %v1793_v39 = vpop.permute.xlu0 %1792 }
 0x440   : > { %v1834_v52 = vadd.f32 %v1793_v39, %v4148_v56 }
 0x447   : > { %v1727_v45 = vpop.permute.xlu0 %1726 }
 0x448   : > { %v1761_v47 = vmul.f32 %v1727_v45, %v4201_v11 }
 0x44a   : > { %1806 = vrot.lane.b32.xlu2 %v1761_v47, %s3613_s5 }
 0x44f   : > { %v1729_v48 = vpop.permute.xlu0 %1728 }
 0x450   : > { %v1762_v49 = vmul.f32 %v1729_v48, %v4207_v13 }
 0x452   : > { %1808 = vrot.lane.b32.xlu0 %v1762_v49, %s3613_s5 }
 0x484   : > { %v1799_v58 = vpop.permute.xlu2 %1798 }
 0x485   : > { %v1837_v0 = vadd.f32 %v1799_v58, %v4174_v2 }
 0x48c   : > { %v1801_v2 = vpop.permute.xlu2 %1800 }
 0x48d   : > { %v1795_v51 = vpop.permute.xlu1 %1794  ;;  %v1838_v15 = vadd.f32 %v1801_v2, %v4180_v4 }
 0x48e   : > { %v1835_v53 = vadd.f32 %v1795_v51, %v4158_v60 }
 0x490   : > { %v1847_v54 = vpack.c.bf16 %v1835_v53, %v1834_v52 }
 0x492   : > { %3233 = vmatmul.msk.bf16.gmra.mxu1 %vm1864_vm5, %v1847_v54 }
 0x494   : > { %v1803_v10 = vpop.permute.xlu0 %1802 }
 0x495   : > { %v1797_v55 = vpop.permute.xlu1 %1796  ;;  %v1839_v14 = vadd.f32 %v1803_v10, %v4186_v6 }
 0x496   : > { %v1836_v59 = vadd.f32 %v1797_v55, %v4166_v63 }
 0x497   : > { %v1849_v16 = vpack.c.bf16 %v1839_v14, %v1838_v15 }
 0x498   : > { %v1848_v1 = vpack.c.bf16 %v1837_v0, %v1836_v59 }
 0x499   : > { %v1898_v57 = vpop.f32.mrf.mxu1 }
 0x49a   : > { %v1899_v60 = vadd.f32 %v4258_v61, %v1898_v57 }
 0x49c   : > { %v1938_v63 = vmax.f32 %v1899_v60, 0.0 }
 0x49d   : > { %v1731_v62 = vpop.permute.xlu1 %1730 }
 0x49e   : > { %v1763_v56 = vmul.f32 %v1731_v62, %v4213_v17 }
 0x4a0   : > { %1810 = vrot.lane.b32.xlu1 %v1763_v56, %s3613_s5 }
 0x4a1   : > { %v1900_v3 = vpop.f32.mrf.mxu1 }
 0x4a2   : > { %v1901_v5 = vadd.f32 %v4258_v61, %v1900_v3  ;;  %3234 = vmatmul.msk.bf16.gmra.mxu1 %vm1864_vm5, %v1848_v1 }
 0x4a4   : > { %v1939_v7 = vmax.f32 %v1901_v5, 0.0  ;;  %v1807_v25 = vpop.permute.xlu2 %1806 }
 0x4a5   : > { %v1805_v24 = vpop.permute.xlu1 %1804  ;;  %v1841_v4 = vadd.f32 %v1807_v25, %v4201_v11 }
 0x4a6   : > { %v1954_v8 = vpack.c.bf16 %v1939_v7, %v1938_v63  ;;  %v1840_v6 = vadd.f32 %v1805_v24, %v4195_v9  ;;  %v3411_v9 = vld [vmem:[%s4561_s18 + $0x8] sm:$0xff] }
 0x4a7   : > { %2137 = vmatpush.bf16.msra.mxu3 %v3411_v9 }
 0x4a8   : > { %3246 = vmatmul.msk.bf16.vlgmr.msrb.gmra.mxu0 %vm1594_vm4, %v1954_v8  ;;  %v1850_v28 = vpack.c.bf16 %v1841_v4, %v1840_v6 }
 0x4a9   : > { %v1903_v12 = vpop.f32.mrf.mxu1 }
 0x4aa   : > { %v1904_v18 = vadd.f32 %v4258_v61, %v1903_v12 }
 0x4ab   : > { %2138 = vmatpush.bf16.msra.mxu3 %v3410_v37 }
 0x4ac   : > { %v1940_v21 = vmax.f32 %v1904_v18, 0.0 }
 0x4b1   : > { %v1905_v19 = vpop.f32.mrf.mxu1 }
 0x4b2   : > { %v1906_v20 = vadd.f32 %v4258_v61, %v1905_v19  ;;  %3235 = vmatmul.msk.bf16.gmra.mxu1 %vm1864_vm5, %v1849_v16 }
 0x4b4   : > { %v1941_v22 = vmax.f32 %v1906_v20, 0.0 }
 0x4b6   : > { %v1955_v23 = vpack.c.bf16 %v1941_v22, %v1940_v21 }
 0x4b8   : > { %3247 = vmatmul.msk.bf16.gmra.mxu0 %vm1594_vm4, %v1955_v23 }
 0x4b9   : > { %v1908_v26 = vpop.f32.mrf.mxu1 }
 0x4ba   : > { %v1909_v29 = vadd.f32 %v4258_v61, %v1908_v26 }
 0x4bc   : > { %v1942_v31 = vmax.f32 %v1909_v29, 0.0 }
 0x4c1   : > { %v1910_v30 = vpop.f32.mrf.mxu1 }
 0x4c2   : > { %v1911_v27 = vadd.f32 %v4258_v61, %v1910_v30  ;;  %3236 = vmatmul.msk.bf16.gmra.mxu1 %vm1864_vm5, %v1850_v28 }
 0x4c4   : > { %v1943_v32 = vmax.f32 %v1911_v27, 0.0  ;;  %v1809_v35 = vpop.permute.xlu0 %1808  ;;  %v3416_v27 = vld [vmem:[%s4563_s20 + $0x18] sm:$0xff] }
 0x4c5   : > { %v1842_v40 = vadd.f32 %v1809_v35, %v4207_v13  ;;  %2268 = vmatpush.bf16.msra.mxu2 %v3416_v27 }
 0x4c6   : > { %v1956_v33 = vpack.c.bf16 %v1943_v32, %v1942_v31  ;;  %v3415_v31 = vld [vmem:[%s4563_s20 + $0x10] sm:$0xff] }
 0x4c8   : > { %3248 = vmatmul.msk.bf16.gmra.mxu0 %vm1594_vm4, %v1956_v33 }
 0x4c9   : > { %2269 = vmatpush.bf16.msra.mxu2 %v3415_v31  ;;  %v3420_v31 = vld [vmem:[%s4565_s22 + $0x18] sm:$0xff] }
 0x50f   : > { %v1913_v11 = vpop.f32.mrf.mxu1 }
 0x510   : > { %v1914_v42 = vadd.f32 %v4258_v61, %v1913_v11  ;;  %v3414_v11 = vld [vmem:[%s4563_s20 + $0x8] sm:$0xff] }
 0x511   : > { %2270 = vmatpush.bf16.msra.mxu2 %v3414_v11 }
 0x512   : > { %v1811_v38 = vpop.permute.xlu1 %1810  ;;  %v1944_v39 = vmax.f32 %v1914_v42, 0.0 }
 0x513   : > { %v1843_v41 = vadd.f32 %v1811_v38, %v4213_v17  ;;  %v4298_v17 = vld [vmem:[%s4560_s17] ss:$0 sm:$0xff] }
 0x515   : > { %v1851_v36 = vpack.c.bf16 %v1843_v41, %v1842_v40  ;;  %v3413_v41 = vld [vmem:[%s4563_s20] sm:$0xff] }
 0x516   : > { %2271 = vmatpush.bf16.msra.mxu2 %v3413_v41 }
 0x517   : > { %v1915_v43 = vpop.f32.mrf.mxu1  ;;  %3237 = vmatmul.msk.bf16.gmra.mxu1 %vm1864_vm5, %v1851_v36 }
 0x518   : > { %v1916_v44 = vadd.f32 %v4258_v61, %v1915_v43 }
 0x51a   : > { %v1945_v45 = vmax.f32 %v1916_v44, 0.0 }
 0x51c   : > { %v1957_v47 = vpack.c.bf16 %v1945_v45, %v1944_v39 }
 0x51e   : > { %3249 = vmatmul.msk.bf16.gmra.mxu0 %vm1594_vm4, %v1957_v47 }
 0x51f   : > { %v1918_v48 = vpop.f32.mrf.mxu1 }
 0x520   : > { %v1919_v46 = vadd.f32 %v4258_v61, %v1918_v48 }
 0x522   : > { %v1946_v51 = vmax.f32 %v1919_v46, 0.0 }
 0x525   : > { %v2015_v49 = vpop.f32.mrf.mxu0 }
 0x526   : > { %v2016_v53 = vadd.f32 %v4298_v17, %v2015_v49 }
 0x527   : > { %v1920_v13 = vpop.f32.mrf.mxu1 }
 0x528   : > { %v1921_v50 = vadd.f32 %v4258_v61, %v1920_v13  ;;  %v2055_v59 = vmax.f32 %v2016_v53, 0.0 }
 0x52a   : > { %v1947_v52 = vmax.f32 %v1921_v50, 0.0 }
 0x52c   : > { %v1958_v54 = vpack.c.bf16 %v1947_v52, %v1946_v51  ;;  %v4340_v51 = vld [vmem:[%s4562_s19] ss:$0 sm:$0xff] }
 0x52d   : > { %v2017_v55 = vpop.f32.mrf.mxu0 }
 0x52e   : > { %v2018_v57 = vadd.f32 %v4298_v17, %v2017_v55  ;;  %3250 = vmatmul.msk.bf16.gmra.mxu0 %vm1594_vm4, %v1958_v54 }
 0x52f   : > { %v1923_v58 = vpop.f32.mrf.mxu1 }
 0x530   : > { %v2056_v62 = vmax.f32 %v2018_v57, 0.0  ;;  %v1924_v1 = vadd.f32 %v4258_v61, %v1923_v58 }
 0x532   : > { %v2071_v0 = vpack.c.bf16 %v2056_v62, %v2055_v59  ;;  %v1948_v5 = vmax.f32 %v1924_v1, 0.0 }
 0x534   : > { %3266 = vmatmul.msk.bf16.vlgmr.msra.gmra.mxu3 %vm1476_vm3, %v2071_v0 }
 0x535   : > { %v2020_v56 = vpop.f32.mrf.mxu0 }
 0x536   : > { %v2021_v7 = vadd.f32 %v4298_v17, %v2020_v56 }
 0x537   : > { %v1925_v60 = vpop.f32.mrf.mxu1 }
 0x538   : > { %v1926_v3 = vadd.f32 %v4258_v61, %v1925_v60  ;;  %v2057_v14 = vmax.f32 %v2021_v7, 0.0 }
 0x53a   : > { %v1949_v63 = vmax.f32 %v1926_v3, 0.0 }
 0x53c   : > { %v1959_v8 = vpack.c.bf16 %v1949_v63, %v1948_v5 }
 0x53d   : > { %v2022_v10 = vpop.f32.mrf.mxu0 }
 0x53e   : > { %v2023_v12 = vadd.f32 %v4298_v17, %v2022_v10  ;;  %3251 = vmatmul.msk.bf16.gmra.mxu0 %vm1594_vm4, %v1959_v8 }
 0x53f   : > { %v1928_v2 = vpop.f32.mrf.mxu1 }
 0x540   : > { %v2058_v15 = vmax.f32 %v2023_v12, 0.0  ;;  %v1929_v19 = vadd.f32 %v4258_v61, %v1928_v2 }
 0x542   : > { %v2072_v16 = vpack.c.bf16 %v2058_v15, %v2057_v14  ;;  %v1950_v22 = vmax.f32 %v1929_v19, 0.0 }
 0x544   : > { %3267 = vmatmul.msk.bf16.gmra.mxu3 %vm1476_vm3, %v2072_v16 }
 0x545   : > { %v2025_v18 = vpop.f32.mrf.mxu0 }
 0x546   : > { %v2026_v25 = vadd.f32 %v4298_v17, %v2025_v18 }
 0x547   : > { %v1930_v20 = vpop.f32.mrf.mxu1 }
 0x548   : > { %v1931_v21 = vadd.f32 %v4258_v61, %v1930_v20  ;;  %v2059_v4 = vmax.f32 %v2026_v25, 0.0 }
 0x54a   : > { %v1951_v23 = vmax.f32 %v1931_v21, 0.0 }
 0x54c   : > { %v1960_v24 = vpack.c.bf16 %v1951_v23, %v1950_v22 }
 0x54d   : > { %v2027_v26 = vpop.f32.mrf.mxu0 }
 0x54e   : > { %v2028_v6 = vadd.f32 %v4298_v17, %v2027_v26  ;;  %3252 = vmatmul.msk.bf16.gmra.mxu0 %vm1594_vm4, %v1960_v24 }
 0x550   : > { %v2060_v28 = vmax.f32 %v2028_v6, 0.0 }
 0x552   : > { %v2073_v29 = vpack.c.bf16 %v2060_v28, %v2059_v4 }
 0x554   : > { %3268 = vmatmul.msk.bf16.gmra.mxu3 %vm1476_vm3, %v2073_v29  ;;  %v3421_v29 = vld [vmem:[%s4565_s22 + $0x20] sm:$0xff] }
 0x555   : > { %2408 = vmatpush.bf16.msra.mxu1 %v3421_v29 }
 0x559   : > { %2409 = vmatpush.bf16.msra.mxu1 %v3420_v31 }
 0x594   : > { %v1933_v30 = vpop.f32.mrf.mxu1 }
 0x595   : > { %v1934_v32 = vadd.f32 %v4258_v61, %v1933_v30 }
 0x597   : > { %v1952_v35 = vmax.f32 %v1934_v32, 0.0 }
 0x59b   : > { %v2030_v33 = vpop.f32.mrf.mxu0 }
 0x59c   : > { %v1935_v34 = vpop.f32.mrf.mxu1  ;;  %v2031_v40 = vadd.f32 %v4298_v17, %v2030_v33 }
 0x59d   : > { %v1936_v9 = vadd.f32 %v4258_v61, %v1935_v34 }
 0x59e   : > { %v2061_v61 = vmax.f32 %v2031_v40, 0.0 }
 0x59f   : > { %v1953_v37 = vmax.f32 %v1936_v9, 0.0  ;;  %v3419_v9 = vld [vmem:[%s4565_s22 + $0x10] sm:$0xff] }
 0x5a0   : > { %2410 = vmatpush.bf16.msra.mxu1 %v3419_v9 }
 0x5a1   : > { %v1961_v38 = vpack.c.bf16 %v1953_v37, %v1952_v35  ;;  %v3418_v37 = vld [vmem:[%s4565_s22 + $0x8] sm:$0xff] }
 0x5a3   : > { %v2032_v36 = vpop.f32.mrf.mxu0  ;;  %3253 = vmatmul.msk.bf16.gmra.mxu0 %vm1594_vm4, %v1961_v38 }
 0x5a4   : > { %v2033_v42 = vadd.f32 %v4298_v17, %v2032_v36  ;;  %2411 = vmatpush.bf16.msra.mxu1 %v3418_v37 }
 0x5a6   : > { %v2062_v43 = vmax.f32 %v2033_v42, 0.0 }
 0x5a8   : > { %v2074_v44 = vpack.c.bf16 %v2062_v43, %v2061_v61 }
 0x5aa   : > { %3269 = vmatmul.msk.bf16.gmra.mxu3 %vm1476_vm3, %v2074_v44 }
 0x5ab   : > { %v2035_v39 = vpop.f32.mrf.mxu0 }
 0x5ac   : > { %v2036_v45 = vadd.f32 %v4298_v17, %v2035_v39 }
 0x5ae   : > { %v2063_v49 = vmax.f32 %v2036_v45, 0.0 }
 0x5b3   : > { %v2037_v47 = vpop.f32.mrf.mxu0 }
 0x5b4   : > { %v2038_v48 = vadd.f32 %v4298_v17, %v2037_v47 }
 0x5b6   : > { %v2064_v46 = vmax.f32 %v2038_v48, 0.0 }
 0x5b7   : > { %v2140_v13 = vpop.f32.mrf.mxu3 }
 0x5b8   : > { %v2075_v50 = vpack.c.bf16 %v2064_v46, %v2063_v49  ;;  %v2141_v53 = vadd.f32 %v4340_v51, %v2140_v13  ;;  %v4384_v13 = vld [vmem:[%s4564_s21] ss:$0 sm:$0xff] }
 0x5ba   : > { %3270 = vmatmul.msk.bf16.gmra.mxu3 %vm1476_vm3, %v2075_v50  ;;  %v2180_v57 = vmax.f32 %v2141_v53, 0.0 }
 0x5bb   : > { %v2040_v52 = vpop.f32.mrf.mxu0 }
 0x5bc   : > { %v2041_v58 = vadd.f32 %v4298_v17, %v2040_v52 }
 0x5be   : > { %v2065_v1 = vmax.f32 %v2041_v58, 0.0 }
 0x5bf   : > { %v2142_v54 = vpop.f32.mrf.mxu3 }
 0x5c0   : > { %v2143_v55 = vadd.f32 %v4340_v51, %v2142_v54 }
 0x5c2   : > { %v2181_v59 = vmax.f32 %v2143_v55, 0.0 }
 0x5c3   : > { %v2042_v62 = vpop.f32.mrf.mxu0 }
 0x5c4   : > { %v2196_v0 = vpack.c.bf16 %v2181_v59, %v2180_v57  ;;  %v2043_v56 = vadd.f32 %v4298_v17, %v2042_v62 }
 0x5c6   : > { %v2066_v60 = vmax.f32 %v2043_v56, 0.0  ;;  %3290 = vmatmul.msk.bf16.vlgmr.msra.gmra.mxu2 %vm1350_vm2, %v2196_v0 }
 0x5c7   : > { %v2145_v3 = vpop.f32.mrf.mxu3 }
 0x5c8   : > { %v2076_v5 = vpack.c.bf16 %v2066_v60, %v2065_v1  ;;  %v2146_v7 = vadd.f32 %v4340_v51, %v2145_v3 }
 0x5ca   : > { %3271 = vmatmul.msk.bf16.gmra.mxu3 %vm1476_vm3, %v2076_v5  ;;  %v2182_v12 = vmax.f32 %v2146_v7, 0.0 }
 0x5cb   : > { %v2045_v63 = vpop.f32.mrf.mxu0 }
 0x5cc   : > { %v2046_v2 = vadd.f32 %v4298_v17, %v2045_v63 }
 0x5ce   : > { %v2067_v19 = vmax.f32 %v2046_v2, 0.0 }
 0x5cf   : > { %v2147_v8 = vpop.f32.mrf.mxu3 }
 0x5d0   : > { %v2148_v10 = vadd.f32 %v4340_v51, %v2147_v8 }
 0x5d2   : > { %v2183_v14 = vmax.f32 %v2148_v10, 0.0 }
 0x5d3   : > { %v2047_v15 = vpop.f32.mrf.mxu0 }
 0x5d4   : > { %v2197_v16 = vpack.c.bf16 %v2183_v14, %v2182_v12  ;;  %v2048_v18 = vadd.f32 %v4298_v17, %v2047_v15 }
 0x5d6   : > { %v2068_v20 = vmax.f32 %v2048_v18, 0.0  ;;  %3291 = vmatmul.msk.bf16.gmra.mxu2 %vm1350_vm2, %v2197_v16 }
 0x5d7   : > { %v2150_v21 = vpop.f32.mrf.mxu3 }
 0x5d8   : > { %v2077_v22 = vpack.c.bf16 %v2068_v20, %v2067_v19  ;;  %v2151_v23 = vadd.f32 %v4340_v51, %v2150_v21 }
 0x5da   : > { %3272 = vmatmul.msk.bf16.gmra.mxu3 %vm1476_vm3, %v2077_v22  ;;  %v2184_v26 = vmax.f32 %v2151_v23, 0.0 }
 0x5df   : > { %v2152_v25 = vpop.f32.mrf.mxu3 }
 0x5e0   : > { %v2153_v24 = vadd.f32 %v4340_v51, %v2152_v25 }
 0x5e2   : > { %v2185_v6 = vmax.f32 %v2153_v24, 0.0 }
 0x5e4   : > { %v2198_v4 = vpack.c.bf16 %v2185_v6, %v2184_v26 }
 0x5e6   : > { %3292 = vmatmul.msk.bf16.gmra.mxu2 %vm1350_vm2, %v2198_v4  ;;  %v3427_v4 = vld [vmem:[%s4567_s24 + $0x28] sm:$0xff] }
 0x5e7   : > { %2556 = vmatpush.bf16.msra.mxu0 %v3427_v4 }
 0x620   : > { %v2050_v28 = vpop.f32.mrf.mxu0 }
 0x621   : > { %v2051_v30 = vadd.f32 %v4298_v17, %v2050_v28  ;;  %v3426_v28 = vld [vmem:[%s4567_s24 + $0x20] sm:$0xff] }
 0x622   : > { %2557 = vmatpush.bf16.msra.mxu0 %v3426_v28 }
 0x623   : > { %v2069_v33 = vmax.f32 %v2051_v30, 0.0  ;;  %v3425_v30 = vld [vmem:[%s4567_s24 + $0x18] sm:$0xff] }
 0x626   : > { %2558 = vmatpush.bf16.msra.mxu0 %v3425_v30 }
 0x628   : > { %v2052_v27 = vpop.f32.mrf.mxu0 }
 0x629   : > { %v2053_v32 = vadd.f32 %v4298_v17, %v2052_v27  ;;  %v3417_v17 = vld [vmem:[%s4565_s22] sm:$0xff]  ;;  %v3424_v27 = vld [vmem:[%s4567_s24 + $0x10] sm:$0xff] }
 0x62a   : > { %2412 = vmatpush.bf16.msra.mxu1 %v3417_v17  ;;  %2559 = vmatpush.bf16.msra.mxu0 %v3424_v27 }
 0x62b   : > { %v2070_v34 = vmax.f32 %v2053_v32, 0.0 }
 0x62d   : > { %v2078_v11 = vpack.c.bf16 %v2070_v34, %v2069_v33  ;;  %v2155_v35 = vpop.f32.mrf.mxu3  ;;  %v3423_v34 = vld [vmem:[%s4567_s24 + $0x8] sm:$0xff] }
 0x62e   : > { %v2156_v38 = vadd.f32 %v4340_v51, %v2155_v35  ;;  %2560 = vmatpush.bf16.msra.mxu0 %v3423_v34 }
 0x62f   : > { %3273 = vmatmul.msk.bf16.gmra.mxu3 %vm1476_vm3, %v2078_v11 }
 0x630   : > { %v2186_v36 = vmax.f32 %v2156_v38, 0.0  ;;  %v3422_v38 = vld [vmem:[%s4567_s24] sm:$0xff] }
 0x632   : > { %2561 = vmatpush.bf16.msra.mxu0 %v3422_v38 }
 0x635   : > { %v2157_v40 = vpop.f32.mrf.mxu3 }
 0x636   : > { %v2158_v41 = vadd.f32 %v4340_v51, %v2157_v40 }
 0x638   : > { %v2187_v42 = vmax.f32 %v2158_v41, 0.0 }
 0x63a   : > { %v2199_v61 = vpack.c.bf16 %v2187_v42, %v2186_v36 }
 0x63c   : > { %3293 = vmatmul.msk.bf16.gmra.mxu2 %vm1350_vm2, %v2199_v61 }
 0x63d   : > { %v2160_v43 = vpop.f32.mrf.mxu3 }
 0x63e   : > { %v2161_v44 = vadd.f32 %v4340_v51, %v2160_v43 }
 0x640   : > { %v2188_v47 = vmax.f32 %v2161_v44, 0.0 }
 0x645   : > { %v2162_v39 = vpop.f32.mrf.mxu3 }
 0x646   : > { %v2163_v45 = vadd.f32 %v4340_v51, %v2162_v39 }
 0x648   : > { %v2189_v48 = vmax.f32 %v2163_v45, 0.0  ;;  %v4430_v45 = vld [vmem:[%s4566_s23] ss:$0 sm:$0xff] }
 0x649   : > { %v2273_v49 = vpop.f32.mrf.mxu2 }
 0x64a   : > { %v2200_v46 = vpack.c.bf16 %v2189_v48, %v2188_v47  ;;  %v2274_v52 = vadd.f32 %v4384_v13, %v2273_v49 }
 0x64c   : > { %3294 = vmatmul.msk.bf16.gmra.mxu2 %vm1350_vm2, %v2200_v46  ;;  %v2313_v55 = vmax.f32 %v2274_v52, 0.0 }
 0x64d   : > { %v2165_v50 = vpop.f32.mrf.mxu3 }
 0x64e   : > { %v2166_v57 = vadd.f32 %v4340_v51, %v2165_v50 }
 0x650   : > { %v2190_v56 = vmax.f32 %v2166_v57, 0.0 }
 0x651   : > { %v2275_v53 = vpop.f32.mrf.mxu2 }
 0x652   : > { %v2276_v54 = vadd.f32 %v4384_v13, %v2275_v53 }
 0x654   : > { %v2314_v58 = vmax.f32 %v2276_v54, 0.0 }
 0x655   : > { %v2167_v59 = vpop.f32.mrf.mxu3 }
 0x656   : > { %v2329_v62 = vpack.c.bf16 %v2314_v58, %v2313_v55  ;;  %v2168_v0 = vadd.f32 %v4340_v51, %v2167_v59 }
 0x658   : > { %v2191_v1 = vmax.f32 %v2168_v0, 0.0  ;;  %3318 = vmatmul.msk.bf16.vlgmr.msra.gmra.mxu1 %vm1216_vm1, %v2329_v62 }
 0x659   : > { %v2278_v60 = vpop.f32.mrf.mxu2 }
 0x65a   : > { %v2201_v3 = vpack.c.bf16 %v2191_v1, %v2190_v56  ;;  %v2279_v63 = vadd.f32 %v4384_v13, %v2278_v60 }
 0x65c   : > { %3295 = vmatmul.msk.bf16.gmra.mxu2 %vm1350_vm2, %v2201_v3  ;;  %v2315_v10 = vmax.f32 %v2279_v63, 0.0 }
 0x65d   : > { %v2170_v5 = vpop.f32.mrf.mxu3 }
 0x65e   : > { %v2171_v12 = vadd.f32 %v4340_v51, %v2170_v5 }
 0x660   : > { %v2192_v18 = vmax.f32 %v2171_v12, 0.0 }
 0x661   : > { %v2280_v7 = vpop.f32.mrf.mxu2 }
 0x662   : > { %v2281_v8 = vadd.f32 %v4384_v13, %v2280_v7 }
 0x664   : > { %v2316_v2 = vmax.f32 %v2281_v8, 0.0 }
 0x665   : > { %v2172_v14 = vpop.f32.mrf.mxu3 }
 0x666   : > { %v2330_v15 = vpack.c.bf16 %v2316_v2, %v2315_v10  ;;  %v2173_v16 = vadd.f32 %v4340_v51, %v2172_v14 }
 0x668   : > { %v2193_v19 = vmax.f32 %v2173_v16, 0.0  ;;  %3319 = vmatmul.msk.bf16.gmra.mxu1 %vm1216_vm1, %v2330_v15 }
 0x669   : > { %v2283_v20 = vpop.f32.mrf.mxu2 }
 0x66a   : > { %v2202_v21 = vpack.c.bf16 %v2193_v19, %v2192_v18  ;;  %v2284_v22 = vadd.f32 %v4384_v13, %v2283_v20 }
 0x66c   : > { %3296 = vmatmul.msk.bf16.gmra.mxu2 %vm1350_vm2, %v2202_v21  ;;  %v2317_v24 = vmax.f32 %v2284_v22, 0.0 }
 0x671   : > { %v2285_v23 = vpop.f32.mrf.mxu2 }
 0x672   : > { %v2286_v25 = vadd.f32 %v4384_v13, %v2285_v23 }
 0x674   : > { %v2318_v26 = vmax.f32 %v2286_v25, 0.0 }
 0x676   : > { %v2331_v6 = vpack.c.bf16 %v2318_v26, %v2317_v24 }
 0x678   : > { %3320 = vmatmul.msk.bf16.gmra.mxu1 %vm1216_vm1, %v2331_v6 }
 0x6b2   : > { %v2175_v29 = vpop.f32.mrf.mxu3 }
 0x6b3   : > { %v2176_v31 = vadd.f32 %v4340_v51, %v2175_v29 }
 0x6b5   : > { %v2194_v9 = vmax.f32 %v2176_v31, 0.0 }
 0x6ba   : > { %v2177_v32 = vpop.f32.mrf.mxu3 }
 0x6bb   : > { %v2178_v33 = vadd.f32 %v4340_v51, %v2177_v32 }
 0x6bd   : > { %v2195_v11 = vmax.f32 %v2178_v33, 0.0 }
 0x6bf   : > { %v2203_v35 = vpack.c.bf16 %v2195_v11, %v2194_v9  ;;  %v2288_v37 = vpop.f32.mrf.mxu2 }
 0x6c0   : > { %v2289_v17 = vadd.f32 %v4384_v13, %v2288_v37 }
 0x6c1   : > { %3297 = vmatmul.msk.bf16.gmra.mxu2 %vm1350_vm2, %v2203_v35 }
 0x6c2   : > { %v2319_v41 = vmax.f32 %v2289_v17, 0.0 }
 0x6c7   : > { %v2290_v40 = vpop.f32.mrf.mxu2 }
 0x6c8   : > { %v2291_v51 = vadd.f32 %v4384_v13, %v2290_v40 }
 0x6ca   : > { %v2320_v36 = vmax.f32 %v2291_v51, 0.0 }
 0x6cc   : > { %v2332_v42 = vpack.c.bf16 %v2320_v36, %v2319_v41 }
 0x6ce   : > { %3321 = vmatmul.msk.bf16.gmra.mxu1 %vm1216_vm1, %v2332_v42 }
 0x6cf   : > { %v2293_v61 = vpop.f32.mrf.mxu2 }
 0x6d0   : > { %v2294_v44 = vadd.f32 %v4384_v13, %v2293_v61 }
 0x6d2   : > { %v2321_v48 = vmax.f32 %v2294_v44, 0.0 }
 0x6d5   : > { %v2414_v43 = vpop.f32.mrf.mxu1 }
 0x6d6   : > { %v2415_v46 = vadd.f32 %v4430_v45, %v2414_v43 }
 0x6d7   : > { %v2295_v39 = vpop.f32.mrf.mxu2 }
 0x6d8   : > { %v2296_v47 = vadd.f32 %v4384_v13, %v2295_v39  ;;  %v2454_v55 = vmax.f32 %v2415_v46, 0.0 }
 0x6da   : > { %v2322_v49 = vmax.f32 %v2296_v47, 0.0 }
 0x6dc   : > { %v2333_v50 = vpack.c.bf16 %v2322_v49, %v2321_v48 }
 0x6dd   : > { %v2416_v52 = vpop.f32.mrf.mxu1 }
 0x6de   : > { %v2417_v53 = vadd.f32 %v4430_v45, %v2416_v52  ;;  %3322 = vmatmul.msk.bf16.gmra.mxu1 %vm1216_vm1, %v2333_v50 }
 0x6df   : > { %v2298_v54 = vpop.f32.mrf.mxu2 }
 0x6e0   : > { %v2455_v57 = vmax.f32 %v2417_v53, 0.0  ;;  %v2299_v62 = vadd.f32 %v4384_v13, %v2298_v54 }
 0x6e2   : > { %v2470_v58 = vpack.c.bf16 %v2455_v57, %v2454_v55  ;;  %v2323_v1 = vmax.f32 %v2299_v62, 0.0 }
 0x6e4   : > { %3350 = vmatmul.msk.bf16.vlgmr.msra.gmra.mxu0 %vm1074_vm0, %v2470_v58 }
 0x6e5   : > { %v2419_v59 = vpop.f32.mrf.mxu1 }
 0x6e6   : > { %v2420_v3 = vadd.f32 %v4430_v45, %v2419_v59 }
 0x6e7   : > { %v2300_v0 = vpop.f32.mrf.mxu2 }
 0x6e8   : > { %v2301_v56 = vadd.f32 %v4384_v13, %v2300_v0  ;;  %v2456_v10 = vmax.f32 %v2420_v3, 0.0 }
 0x6ea   : > { %v2324_v60 = vmax.f32 %v2301_v56, 0.0 }
 0x6ec   : > { %v2334_v5 = vpack.c.bf16 %v2324_v60, %v2323_v1 }
 0x6ed   : > { %v2421_v63 = vpop.f32.mrf.mxu1 }
 0x6ee   : > { %v2422_v7 = vadd.f32 %v4430_v45, %v2421_v63  ;;  %3323 = vmatmul.msk.bf16.gmra.mxu1 %vm1216_vm1, %v2334_v5 }
 0x6ef   : > { %v2303_v8 = vpop.f32.mrf.mxu2 }
 0x6f0   : > { %v2457_v12 = vmax.f32 %v2422_v7, 0.0  ;;  %v2304_v15 = vadd.f32 %v4384_v13, %v2303_v8 }
 0x6f2   : > { %v2471_v2 = vpack.c.bf16 %v2457_v12, %v2456_v10  ;;  %v2325_v19 = vmax.f32 %v2304_v15, 0.0 }
 0x6f4   : > { %3351 = vmatmul.msk.bf16.gmra.mxu0 %vm1074_vm0, %v2471_v2 }
 0x6f5   : > { %v2424_v14 = vpop.f32.mrf.mxu1 }
 0x6f6   : > { %v2425_v21 = vadd.f32 %v4430_v45, %v2424_v14 }
 0x6f7   : > { %v2305_v16 = vpop.f32.mrf.mxu2 }
 0x6f8   : > { %v2306_v18 = vadd.f32 %v4384_v13, %v2305_v16  ;;  %v2458_v24 = vmax.f32 %v2425_v21, 0.0 }
 0x6fa   : > { %v2326_v20 = vmax.f32 %v2306_v18, 0.0 }
 0x6fc   : > { %v2335_v22 = vpack.c.bf16 %v2326_v20, %v2325_v19 }
 0x6fd   : > { %v2426_v23 = vpop.f32.mrf.mxu1 }
 0x6fe   : > { %v2427_v25 = vadd.f32 %v4430_v45, %v2426_v23  ;;  %3324 = vmatmul.msk.bf16.gmra.mxu1 %vm1216_vm1, %v2335_v22 }
 0x700   : > { %v2459_v26 = vmax.f32 %v2427_v25, 0.0 }
 0x702   : > { %v2472_v6 = vpack.c.bf16 %v2459_v26, %v2458_v24 }
 0x704   : > { %3352 = vmatmul.msk.bf16.gmra.mxu0 %vm1074_vm0, %v2472_v6 }
 0x744   : > { %v2308_v4 = vpop.f32.mrf.mxu2 }
 0x745   : > { %v2309_v28 = vadd.f32 %v4384_v13, %v2308_v4 }
 0x747   : > { %v2327_v31 = vmax.f32 %v2309_v28, 0.0 }
 0x74b   : > { %v2429_v29 = vpop.f32.mrf.mxu1 }
 0x74c   : > { %v2310_v30 = vpop.f32.mrf.mxu2  ;;  %v2430_v34 = vadd.f32 %v4430_v45, %v2429_v29 }
 0x74d   : > { %v2311_v27 = vadd.f32 %v4384_v13, %v2310_v30  ;;  %v4458_v13 = vld [vmem:[%s4568_s25] ss:$0 sm:$0xff] }
 0x74e   : > { %v2460_v35 = vmax.f32 %v2430_v34, 0.0 }
 0x74f   : > { %v2328_v32 = vmax.f32 %v2311_v27, 0.0 }
 0x751   : > { %v2336_v33 = vpack.c.bf16 %v2328_v32, %v2327_v31 }
 0x753   : > { %v2431_v9 = vpop.f32.mrf.mxu1  ;;  %3325 = vmatmul.msk.bf16.gmra.mxu1 %vm1216_vm1, %v2336_v33 }
 0x754   : > { %v2432_v11 = vadd.f32 %v4430_v45, %v2431_v9 }
 0x756   : > { %v2461_v37 = vmax.f32 %v2432_v11, 0.0 }
 0x758   : > { %v2473_v38 = vpack.c.bf16 %v2461_v37, %v2460_v35 }
 0x75a   : > { %3353 = vmatmul.msk.bf16.gmra.mxu0 %vm1074_vm0, %v2473_v38 }
 0x75b   : > { %v2434_v17 = vpop.f32.mrf.mxu1 }
 0x75c   : > { %v2435_v51 = vadd.f32 %v4430_v45, %v2434_v17 }
 0x75e   : > { %v2462_v43 = vmax.f32 %v2435_v51, 0.0 }
 0x761   : > { %v2563_v40 = vpop.f32.mrf.mxu0 }
 0x762   : > { %v2564_v41 = vadd.f32 %v4458_v13, %v2563_v40 }
 0x763   : > { %v2436_v36 = vpop.f32.mrf.mxu1 }
 0x764   : > { %v3358_v42 = vmul.f32 -1.442695, %v2564_v41  ;;  %v2437_v61 = vadd.f32 %v4430_v45, %v2436_v36 }
 0x766   : > { %3484 = vpow2.f32 %v3358_v42  ;;  %v2463_v44 = vmax.f32 %v2437_v61, 0.0 }
 0x768   : > { %v2474_v39 = vpack.c.bf16 %v2463_v44, %v2462_v43 }
 0x769   : > { %v2565_v47 = vpop.f32.mrf.mxu0 }
 0x76a   : > { %v2566_v48 = vadd.f32 %v4458_v13, %v2565_v47  ;;  %3354 = vmatmul.msk.bf16.gmra.mxu0 %vm1074_vm0, %v2474_v39 }
 0x76b   : > { %v2439_v49 = vpop.f32.mrf.mxu1 }
 0x76c   : > { %v3485_v46 = vpop.eup %3484  ;;  %v3359_v50 = vmul.f32 -1.442695, %v2566_v48  ;;  %v2440_v54 = vadd.f32 %v4430_v45, %v2439_v49 }
 0x76d   : > { %v2651_v52 = vadd.f32 1.0, %v3485_v46 }
 0x76e   : > { %3486 = vpow2.f32 %v3359_v50  ;;  %v2464_v60 = vmax.f32 %v2440_v54, 0.0 }
 0x76f   : > { %3488 = vrcp.f32 %v2651_v52  ;;  %v2678_v7 = vand.u32 2147483648, %v2651_v52  ;;  %v2676_v12 = vand.u32 2147483647, %v2651_v52  ;;  %vm2672_vm7 = vweird.f32 %v2651_v52 }
 0x771   : > { %v2568_v53 = vpop.f32.mrf.mxu0  ;;  %v2679_v20 = vor.u32 1.1754944e-38, %v2678_v7  ;;  %vm2677_vm9 = vcmp.eq.f32.partialorder %v2676_v12, 8.507059e+37 }
 0x772   : > { %v2569_v55 = vadd.f32 %v4458_v13, %v2568_v53 }
 0x773   : > { %v2441_v57 = vpop.f32.mrf.mxu1 }
 0x774   : > { %v3487_v58 = vpop.eup %3486  ;;  %v3360_v59 = vmul.f32 -1.442695, %v2569_v55  ;;  %v2442_v62 = vadd.f32 %v4430_v45, %v2441_v57 }
 0x775   : > { %v3489_v0 = vpop.eup %3488  ;;  %v2652_v56 = vadd.f32 1.0, %v3487_v58 }
 0x776   : > { %v2668_v1 = vmul.f32 %v3489_v0, %v2651_v52  ;;  %3490 = vpow2.f32 %v3360_v59  ;;  %v2465_v3 = vmax.f32 %v2442_v62, 0.0  ;;  %vm2673_vm6 = vweird.f32 %v3489_v0 }
 0x777   : > { %3492 = vrcp.f32 %v2652_v56  ;;  %vm2674_vm8 = vmor %vm2672_vm7, %vm2673_vm6  ;;  %v2693_v26 = vand.u32 2147483648, %v2652_v56  ;;  %v2691_v28 = vand.u32 2147483647, %v2652_v56  ;;  %vm2687_vm11 = vweird.f32 %v2652_v56 }
 0x778   : > { %v2669_v5 = vsub.f32 1.0, %v2668_v1  ;;  %v2475_v63 = vpack.c.bf16 %v2465_v3, %v2464_v60 }
 0x779   : > { %v2570_v8 = vpop.f32.mrf.mxu0  ;;  %v2694_v11 = vor.u32 1.1754944e-38, %v2693_v26  ;;  %vm2692_vm13 = vcmp.eq.f32.partialorder %v2691_v28, 8.507059e+37 }
 0x77a   : > { %v2670_v10 = vmul.f32 %v3489_v0, %v2669_v5  ;;  %v2571_v2 = vadd.f32 %v4458_v13, %v2570_v8  ;;  %3355 = vmatmul.msk.bf16.gmra.mxu0 %vm1074_vm0, %v2475_v63 }
 0x77b   : > { %v2444_v14 = vpop.f32.mrf.mxu1 }
 0x77c   : > { %v3491_v15 = vpop.eup %3490  ;;  %v2671_v16 = vadd.f32 %v3489_v0, %v2670_v10  ;;  %v3361_v18 = vmul.f32 -1.442695, %v2571_v2  ;;  %v2445_v32 = vadd.f32 %v4430_v45, %v2444_v14 }
 0x77d   : > { %v3493_v19 = vpop.eup %3492  ;;  %v2653_v21 = vadd.f32 1.0, %v3491_v15 }
 0x77e   : > { %v2675_v22 = vsel %vm2674_vm8, %v3489_v0, %v2671_v16  ;;  %v2683_v23 = vmul.f32 %v3493_v19, %v2652_v56  ;;  %3494 = vpow2.f32 %v3361_v18  ;;  %vm2688_vm10 = vweird.f32 %v3493_v19 }
 0x77f   : > { %v2680_v25 = vsel %vm2677_vm9, %v2679_v20, %v2675_v22  ;;  %3496 = vrcp.f32 %v2653_v21  ;;  %vm2689_vm12 = vmor %vm2687_vm11, %vm2688_vm10  ;;  %v2466_v51 = vmax.f32 %v2445_v32, 0.0  ;;  %v2706_v36 = vand.u32 2147483647, %v2653_v21 }
 0x780   : > { %2907 = vst [vmem:[%s4473_s6] sm:$0xff] %v2680_v25  ;;  %v2684_v24 = vsub.f32 1.0, %v2683_v23  ;;  %v2708_v42 = vand.u32 2147483648, %v2653_v21  ;;  %vm2702_vm15 = vweird.f32 %v2653_v21 }
 0x781   : > { %v2573_v6 = vpop.f32.mrf.mxu0  ;;  %vm2707_vm2 = vcmp.eq.f32.partialorder %v2706_v36, 8.507059e+37 }
 0x782   : > { %v2685_v4 = vmul.f32 %v3493_v19, %v2684_v24  ;;  %v2574_v29 = vadd.f32 %v4458_v13, %v2573_v6  ;;  %v2709_v50 = vor.u32 1.1754944e-38, %v2708_v42 }
 0x783   : > { %v2446_v30 = vpop.f32.mrf.mxu1 }
 0x784   : > { %v3495_v27 = vpop.eup %3494  ;;  %v2686_v31 = vadd.f32 %v3493_v19, %v2685_v4  ;;  %v3362_v33 = vmul.f32 -1.442695, %v2574_v29  ;;  %v2447_v34 = vadd.f32 %v4430_v45, %v2446_v30 }
 0x785   : > { %v3497_v9 = vpop.eup %3496  ;;  %v2654_v35 = vadd.f32 1.0, %v3495_v27 }
 0x786   : > { %v2690_v37 = vsel %vm2689_vm12, %v3493_v19, %v2686_v31  ;;  %v2698_v38 = vmul.f32 %v3497_v9, %v2653_v21  ;;  %3498 = vpow2.f32 %v3362_v33  ;;  %v2467_v41 = vmax.f32 %v2447_v34, 0.0 }
 0x787   : > { %v2695_v17 = vsel %vm2692_vm13, %v2694_v11, %v2690_v37  ;;  %3500 = vrcp.f32 %v2654_v35  ;;  %vm2703_vm14 = vweird.f32 %v3497_v9  ;;  %v2723_v58 = vand.u32 2147483648, %v2654_v35 }
 0x788   : > { %2908 = vst [vmem:[%s4473_s6 + $0x8] sm:$0xff] %v2695_v17  ;;  %v2699_v40 = vsub.f32 1.0, %v2698_v38  ;;  %v2476_v44 = vpack.c.bf16 %v2467_v41, %v2466_v51  ;;  %vm2704_vm1 = vmor %vm2702_vm15, %vm2703_vm14  ;;  %v2721_v62 = vand.u32 2147483647, %v2654_v35  ;;  %vm2717_vm4 = vweird.f32 %v2654_v35 }
 0x789   : > { %v2575_v61 = vpop.f32.mrf.mxu0  ;;  %v2724_v60 = vor.u32 1.1754944e-38, %v2723_v58 }
 0x78a   : > { %v2700_v43 = vmul.f32 %v3497_v9, %v2699_v40  ;;  %v2576_v39 = vadd.f32 %v4458_v13, %v2575_v61  ;;  %3356 = vmatmul.msk.bf16.gmra.mxu0 %vm1074_vm0, %v2476_v44  ;;  %vm2722_vm6 = vcmp.eq.f32.partialorder %v2721_v62, 8.507059e+37 }
 0x78c   : > { %v3499_v47 = vpop.eup %3498  ;;  %v2701_v48 = vadd.f32 %v3497_v9, %v2700_v43  ;;  %v3363_v49 = vmul.f32 -1.442695, %v2576_v39 }
 0x78d   : > { %v3501_v46 = vpop.eup %3500  ;;  %v2655_v52 = vadd.f32 1.0, %v3499_v47 }
 0x78e   : > { %v2705_v53 = vsel %vm2704_vm1, %v3497_v9, %v2701_v48  ;;  %v2713_v54 = vmul.f32 %v3501_v46, %v2654_v35  ;;  %3502 = vpow2.f32 %v3363_v49  ;;  %vm2718_vm3 = vweird.f32 %v3501_v46 }
 0x78f   : > { %v2710_v55 = vsel %vm2707_vm2, %v2709_v50, %v2705_v53  ;;  %3504 = vrcp.f32 %v2655_v52  ;;  %vm2719_vm5 = vmor %vm2717_vm4, %vm2718_vm3  ;;  %v2738_v10 = vand.u32 2147483648, %v2655_v52  ;;  %v2736_v2 = vand.u32 2147483647, %v2655_v52 }
 0x790   : > { %2909 = vst [vmem:[%s4473_s6 + $0x10] sm:$0xff] %v2710_v55  ;;  %v2714_v57 = vsub.f32 1.0, %v2713_v54  ;;  %vm2732_vm8 = vweird.f32 %v2655_v52 }
 0x791   : > { %v2739_v16 = vor.u32 1.1754944e-38, %v2738_v10  ;;  %vm2737_vm10 = vcmp.eq.f32.partialorder %v2736_v2, 8.507059e+37 }
 0x792   : > { %v2715_v59 = vmul.f32 %v3501_v46, %v2714_v57 }
 0x794   : > { %v3503_v0 = vpop.eup %3502  ;;  %v2716_v56 = vadd.f32 %v3501_v46, %v2715_v59 }
 0x795   : > { %v3505_v1 = vpop.eup %3504  ;;  %v2656_v3 = vadd.f32 1.0, %v3503_v0 }
 0x796   : > { %v2720_v5 = vsel %vm2719_vm5, %v3501_v46, %v2716_v56  ;;  %v2728_v63 = vmul.f32 %v3505_v1, %v2655_v52  ;;  %vm2733_vm7 = vweird.f32 %v3505_v1 }
 0x797   : > { %v2725_v7 = vsel %vm2722_vm6, %v2724_v60, %v2720_v5  ;;  %3506 = vrcp.f32 %v2656_v3  ;;  %vm2734_vm9 = vmor %vm2732_vm8, %vm2733_vm7  ;;  %v2753_v22 = vand.u32 2147483648, %v2656_v3  ;;  %v2751_v25 = vand.u32 2147483647, %v2656_v3 }
 0x798   : > { %2910 = vst [vmem:[%s4473_s6 + $0x18] sm:$0xff] %v2725_v7  ;;  %v2729_v8 = vsub.f32 1.0, %v2728_v63  ;;  %vm2747_vm12 = vweird.f32 %v2656_v3 }
 0x799   : > { %v2754_v26 = vor.u32 1.1754944e-38, %v2753_v22  ;;  %vm2752_vm14 = vcmp.eq.f32.partialorder %v2751_v25, 8.507059e+37 }
 0x79a   : > { %v2730_v12 = vmul.f32 %v3505_v1, %v2729_v8 }
 0x79c   : > { %v2731_v14 = vadd.f32 %v3505_v1, %v2730_v12 }
 0x79d   : > { %v3507_v15 = vpop.eup %3506 }
 0x79e   : > { %v2735_v18 = vsel %vm2734_vm9, %v3505_v1, %v2731_v14  ;;  %v2743_v19 = vmul.f32 %v3507_v15, %v2656_v3  ;;  %vm2748_vm11 = vweird.f32 %v3507_v15 }
 0x79f   : > { %v2740_v20 = vsel %vm2737_vm10, %v2739_v16, %v2735_v18  ;;  %vm2749_vm13 = vmor %vm2747_vm12, %vm2748_vm11 }
 0x7a0   : > { %2911 = vst [vmem:[%s4473_s6 + $0x20] sm:$0xff] %v2740_v20  ;;  %v2744_v21 = vsub.f32 1.0, %v2743_v19 }
 0x7a2   : > { %v2745_v23 = vmul.f32 %v3507_v15, %v2744_v21 }
 0x7a4   : > { %v2746_v24 = vadd.f32 %v3507_v15, %v2745_v23 }
 0x7a6   : > { %v2750_v6 = vsel %vm2749_vm13, %v3507_v15, %v2746_v24 }
 0x7a7   : > { %v2755_v4 = vsel %vm2752_vm14, %v2754_v26, %v2750_v6 }
 0x7a8   : > { %2912 = vst [vmem:[%s4473_s6 + $0x28] sm:$0xff] %v2755_v4 }
 0x7d0   : > { %v2449_v28 = vpop.f32.mrf.mxu1 }
 0x7d1   : > { %v2450_v29 = vadd.f32 %v4430_v45, %v2449_v28 }
 0x7d3   : > { %v2468_v34 = vmax.f32 %v2450_v29, 0.0 }
 0x7d7   : > { %v2578_v30 = vpop.f32.mrf.mxu0 }
 0x7d8   : > { %v2579_v27 = vadd.f32 %v4458_v13, %v2578_v30  ;;  %v2451_v31 = vpop.f32.mrf.mxu1 }
 0x7d9   : > { %v2452_v32 = vadd.f32 %v4430_v45, %v2451_v31 }
 0x7da   : > { %v3364_v33 = vmul.f32 -1.442695, %v2579_v27 }
 0x7db   : > { %v2469_v9 = vmax.f32 %v2452_v32, 0.0 }
 0x7dc   : > { %3508 = vpow2.f32 %v3364_v33 }
 0x7dd   : > { %v2477_v11 = vpack.c.bf16 %v2469_v9, %v2468_v34 }
 0x7df   : > { %v2580_v35 = vpop.f32.mrf.mxu0  ;;  %3357 = vmatmul.msk.bf16.gmra.mxu0 %vm1074_vm0, %v2477_v11 }
 0x7e0   : > { %v2581_v37 = vadd.f32 %v4458_v13, %v2580_v35 }
 0x7e2   : > { %v3509_v38 = vpop.eup %3508  ;;  %v3365_v17 = vmul.f32 -1.442695, %v2581_v37 }
 0x7e3   : > { %v2657_v40 = vadd.f32 1.0, %v3509_v38 }
 0x7e4   : > { %3510 = vpow2.f32 %v3365_v17 }
 0x7e5   : > { %3512 = vrcp.f32 %v2657_v40  ;;  %v2768_v39 = vand.u32 2147483648, %v2657_v40  ;;  %v2766_v49 = vand.u32 2147483647, %v2657_v40  ;;  %vm2762_vm15 = vweird.f32 %v2657_v40 }
 0x7e7   : > { %v2583_v51 = vpop.f32.mrf.mxu0  ;;  %v2769_v55 = vor.u32 1.1754944e-38, %v2768_v39  ;;  %vm2767_vm2 = vcmp.eq.f32.partialorder %v2766_v49, 8.507059e+37 }
 0x7e8   : > { %v2584_v41 = vadd.f32 %v4458_v13, %v2583_v51 }
 0x7ea   : > { %v3511_v36 = vpop.eup %3510  ;;  %v3366_v45 = vmul.f32 -1.442695, %v2584_v41 }
 0x7eb   : > { %v3513_v42 = vpop.eup %3512  ;;  %v2658_v61 = vadd.f32 1.0, %v3511_v36 }
 0x7ec   : > { %v2758_v43 = vmul.f32 %v3513_v42, %v2657_v40  ;;  %3514 = vpow2.f32 %v3366_v45  ;;  %vm2763_vm0 = vweird.f32 %v3513_v42 }
 0x7ed   : > { %3516 = vrcp.f32 %v2658_v61  ;;  %vm2764_vm1 = vmor %vm2762_vm15, %vm2763_vm0  ;;  %v2783_v56 = vand.u32 2147483648, %v2658_v61  ;;  %v2781_v3 = vand.u32 2147483647, %v2658_v61  ;;  %vm2777_vm4 = vweird.f32 %v2658_v61 }
 0x7ee   : > { %v2759_v44 = vsub.f32 1.0, %v2758_v43 }
 0x7ef   : > { %v2585_v47 = vpop.f32.mrf.mxu0  ;;  %v2784_v12 = vor.u32 1.1754944e-38, %v2783_v56  ;;  %vm2782_vm6 = vcmp.eq.f32.partialorder %v2781_v3, 8.507059e+37 }
 0x7f0   : > { %v2760_v48 = vmul.f32 %v3513_v42, %v2759_v44  ;;  %v2586_v46 = vadd.f32 %v4458_v13, %v2585_v47 }
 0x7f2   : > { %v3515_v50 = vpop.eup %3514  ;;  %v2761_v52 = vadd.f32 %v3513_v42, %v2760_v48  ;;  %v3367_v53 = vmul.f32 -1.442695, %v2586_v46 }
 0x7f3   : > { %v3517_v54 = vpop.eup %3516  ;;  %v2659_v57 = vadd.f32 1.0, %v3515_v50 }
 0x7f4   : > { %v2765_v58 = vsel %vm2764_vm1, %v3513_v42, %v2761_v52  ;;  %v2773_v59 = vmul.f32 %v3517_v54, %v2658_v61  ;;  %3518 = vpow2.f32 %v3367_v53  ;;  %vm2778_vm3 = vweird.f32 %v3517_v54 }
 0x7f5   : > { %v2770_v62 = vsel %vm2767_vm2, %v2769_v55, %v2765_v58  ;;  %3520 = vrcp.f32 %v2659_v57  ;;  %vm2779_vm5 = vmor %vm2777_vm4, %vm2778_vm3  ;;  %v2798_v19 = vand.u32 2147483648, %v2659_v57  ;;  %v2796_v22 = vand.u32 2147483647, %v2659_v57 }
 0x7f6   : > { %2913 = vst [vmem:[%s4473_s6 + $0x30] sm:$0xff] %v2770_v62  ;;  %v2774_v0 = vsub.f32 1.0, %v2773_v59  ;;  %vm2792_vm8 = vweird.f32 %v2659_v57 }
 0x7f7   : > { %v2588_v1 = vpop.f32.mrf.mxu0  ;;  %v2799_v4 = vor.u32 1.1754944e-38, %v2798_v19  ;;  %vm2797_vm10 = vcmp.eq.f32.partialorder %v2796_v22, 8.507059e+37 }
 0x7f8   : > { %v2775_v60 = vmul.f32 %v3517_v54, %v2774_v0  ;;  %v2589_v5 = vadd.f32 %v4458_v13, %v2588_v1 }
 0x7fa   : > { %v3519_v63 = vpop.eup %3518  ;;  %v2776_v7 = vadd.f32 %v3517_v54, %v2775_v60  ;;  %v3368_v8 = vmul.f32 -1.442695, %v2589_v5 }
 0x7fb   : > { %v3521_v10 = vpop.eup %3520  ;;  %v2660_v2 = vadd.f32 1.0, %v3519_v63 }
 0x7fc   : > { %v2780_v14 = vsel %vm2779_vm5, %v3517_v54, %v2776_v7  ;;  %v2788_v15 = vmul.f32 %v3521_v10, %v2659_v57  ;;  %3522 = vpow2.f32 %v3368_v8  ;;  %vm2793_vm7 = vweird.f32 %v3521_v10 }
 0x7fd   : > { %v2785_v16 = vsel %vm2782_vm6, %v2784_v12, %v2780_v14  ;;  %3524 = vrcp.f32 %v2660_v2  ;;  %vm2794_vm9 = vmor %vm2792_vm8, %vm2793_vm7  ;;  %v2813_v32 = vand.u32 2147483648, %v2660_v2  ;;  %v2811_v34 = vand.u32 2147483647, %v2660_v2 }
 0x7fe   : > { %2914 = vst [vmem:[%s4473_s6 + $0x38] sm:$0xff] %v2785_v16  ;;  %v2789_v18 = vsub.f32 1.0, %v2788_v15  ;;  %vm2807_vm12 = vweird.f32 %v2660_v2 }
 0x7ff   : > { %v2590_v20 = vpop.f32.mrf.mxu0  ;;  %v2814_v17 = vor.u32 1.1754944e-38, %v2813_v32  ;;  %vm2812_vm14 = vcmp.eq.f32.partialorder %v2811_v34, 8.507059e+37 }
 0x800   : > { %v2790_v21 = vmul.f32 %v3521_v10, %v2789_v18  ;;  %v2591_v23 = vadd.f32 %v4458_v13, %v2590_v20 }
 0x802   : > { %v3523_v25 = vpop.eup %3522  ;;  %v2791_v24 = vadd.f32 %v3521_v10, %v2790_v21  ;;  %v3369_v26 = vmul.f32 -1.442695, %v2591_v23 }
 0x803   : > { %v3525_v6 = vpop.eup %3524  ;;  %v2661_v28 = vadd.f32 1.0, %v3523_v25 }
 0x804   : > { %v2795_v29 = vsel %vm2794_vm9, %v3521_v10, %v2791_v24  ;;  %v2803_v30 = vmul.f32 %v3525_v6, %v2660_v2  ;;  %3526 = vpow2.f32 %v3369_v26  ;;  %vm2808_vm11 = vweird.f32 %v3525_v6 }
 0x805   : > { %v2800_v27 = vsel %vm2797_vm10, %v2799_v4, %v2795_v29  ;;  %3528 = vrcp.f32 %v2661_v28  ;;  %vm2809_vm13 = vmor %vm2807_vm12, %vm2808_vm11  ;;  %v2828_v61 = vand.u32 2147483648, %v2661_v28  ;;  %v2826_v44 = vand.u32 2147483647, %v2661_v28 }
 0x806   : > { %2915 = vst [vmem:[%s4473_s6 + $0x40] sm:$0xff] %v2800_v27  ;;  %v2804_v31 = vsub.f32 1.0, %v2803_v30  ;;  %vm2822_vm15 = vweird.f32 %v2661_v28 }
 0x807   : > { %v2593_v9 = vpop.f32.mrf.mxu0  ;;  %v2829_v46 = vor.u32 1.1754944e-38, %v2828_v61  ;;  %vm2827_vm2 = vcmp.eq.f32.partialorder %v2826_v44, 8.507059e+37 }
 0x808   : > { %v2805_v33 = vmul.f32 %v3525_v6, %v2804_v31  ;;  %v2594_v37 = vadd.f32 %v4458_v13, %v2593_v9 }
 0x80a   : > { %v3527_v11 = vpop.eup %3526  ;;  %v2806_v35 = vadd.f32 %v3525_v6, %v2805_v33  ;;  %v3370_v36 = vmul.f32 -1.442695, %v2594_v37 }
 0x80b   : > { %v3529_v38 = vpop.eup %3528  ;;  %v2662_v40 = vadd.f32 1.0, %v3527_v11 }
 0x80c   : > { %v2810_v51 = vsel %vm2809_vm13, %v3525_v6, %v2806_v35  ;;  %v2818_v41 = vmul.f32 %v3529_v38, %v2661_v28  ;;  %vm2823_vm0 = vweird.f32 %v3529_v38 }
 0x80d   : > { %v2815_v45 = vsel %vm2812_vm14, %v2814_v17, %v2810_v51  ;;  %3530 = vrcp.f32 %v2662_v40  ;;  %vm2824_vm1 = vmor %vm2822_vm15, %vm2823_vm0  ;;  %v2843_v59 = vand.u32 2147483648, %v2662_v40  ;;  %v2841_v0 = vand.u32 2147483647, %v2662_v40 }
 0x80e   : > { %2916 = vst [vmem:[%s4473_s6 + $0x48] sm:$0xff] %v2815_v45  ;;  %v2819_v42 = vsub.f32 1.0, %v2818_v41  ;;  %3532 = vpow2.f32 %v3370_v36  ;;  %vm2837_vm4 = vweird.f32 %v2662_v40 }
 0x80f   : > { %v2595_v39 = vpop.f32.mrf.mxu0  ;;  %v2844_v1 = vor.u32 1.1754944e-38, %v2843_v59  ;;  %vm2842_vm6 = vcmp.eq.f32.partialorder %v2841_v0, 8.507059e+37 }
 0x810   : > { %v2820_v43 = vmul.f32 %v3529_v38, %v2819_v42  ;;  %v2596_v48 = vadd.f32 %v4458_v13, %v2595_v39 }
 0x812   : > { %v2821_v47 = vadd.f32 %v3529_v38, %v2820_v43  ;;  %v3371_v54 = vmul.f32 -1.442695, %v2596_v48 }
 0x813   : > { %v3531_v49 = vpop.eup %3530 }
 0x814   : > { %v3533_v50 = vpop.eup %3532  ;;  %v2825_v52 = vsel %vm2824_vm1, %v3529_v38, %v2821_v47  ;;  %v2833_v53 = vmul.f32 %v3531_v49, %v2662_v40  ;;  %3534 = vpow2.f32 %v3371_v54  ;;  %vm2838_vm3 = vweird.f32 %v3531_v49 }
 0x815   : > { %v2830_v55 = vsel %vm2827_vm2, %v2829_v46, %v2825_v52  ;;  %v2663_v57 = vadd.f32 1.0, %v3533_v50  ;;  %vm2839_vm5 = vmor %vm2837_vm4, %vm2838_vm3 }
 0x816   : > { %2917 = vst [vmem:[%s4473_s6 + $0x50] sm:$0xff] %v2830_v55  ;;  %v2834_v58 = vsub.f32 1.0, %v2833_v53 }
 0x817   : > { %3536 = vrcp.f32 %v2663_v57  ;;  %v2858_v12 = vand.u32 2147483648, %v2663_v57  ;;  %v2856_v14 = vand.u32 2147483647, %v2663_v57  ;;  %vm2852_vm8 = vweird.f32 %v2663_v57 }
 0x818   : > { %v2835_v62 = vmul.f32 %v3531_v49, %v2834_v58 }
 0x819   : > { %v2859_v18 = vor.u32 1.1754944e-38, %v2858_v12  ;;  %vm2857_vm10 = vcmp.eq.f32.partialorder %v2856_v14, 8.507059e+37 }
 0x81a   : > { %v2836_v56 = vadd.f32 %v3531_v49, %v2835_v62  ;;  %v3535_v60 = vpop.eup %3534 }
 0x81b   : > { %v2664_v7 = vadd.f32 1.0, %v3535_v60 }
 0x81c   : > { %v2840_v3 = vsel %vm2839_vm5, %v3531_v49, %v2836_v56 }
 0x81d   : > { %v3537_v5 = vpop.eup %3536  ;;  %v2845_v63 = vsel %vm2842_vm6, %v2844_v1, %v2840_v3  ;;  %3538 = vrcp.f32 %v2664_v7  ;;  %v2873_v23 = vand.u32 2147483648, %v2664_v7  ;;  %v2871_v24 = vand.u32 2147483647, %v2664_v7 }
 0x81e   : > { %2918 = vst [vmem:[%s4473_s6 + $0x58] sm:$0xff] %v2845_v63  ;;  %v2848_v8 = vmul.f32 %v3537_v5, %v2663_v57  ;;  %vm2853_vm7 = vweird.f32 %v3537_v5  ;;  %vm2867_vm12 = vweird.f32 %v2664_v7 }
 0x81f   : > { %vm2854_vm9 = vmor %vm2852_vm8, %vm2853_vm7  ;;  %v2874_v6 = vor.u32 1.1754944e-38, %v2873_v23  ;;  %vm2872_vm14 = vcmp.eq.f32.partialorder %v2871_v24, 8.507059e+37 }
 0x820   : > { %v2849_v10 = vsub.f32 1.0, %v2848_v8 }
 0x822   : > { %v2850_v2 = vmul.f32 %v3537_v5, %v2849_v10 }
 0x823   : > { %v3539_v16 = vpop.eup %3538 }
 0x824   : > { %v2851_v15 = vadd.f32 %v3537_v5, %v2850_v2  ;;  %v2863_v20 = vmul.f32 %v3539_v16, %v2664_v7  ;;  %vm2868_vm11 = vweird.f32 %v3539_v16 }
 0x825   : > { %vm2869_vm13 = vmor %vm2867_vm12, %vm2868_vm11 }
 0x826   : > { %v2855_v19 = vsel %vm2854_vm9, %v3537_v5, %v2851_v15  ;;  %v2864_v22 = vsub.f32 1.0, %v2863_v20 }
 0x827   : > { %v2860_v21 = vsel %vm2857_vm10, %v2859_v18, %v2855_v19 }
 0x828   : > { %2919 = vst [vmem:[%s4473_s6 + $0x60] sm:$0xff] %v2860_v21  ;;  %v2865_v25 = vmul.f32 %v3539_v16, %v2864_v22 }
 0x82a   : > { %v2866_v26 = vadd.f32 %v3539_v16, %v2865_v25 }
 0x82c   : > { %v2870_v4 = vsel %vm2869_vm13, %v3539_v16, %v2866_v26 }
 0x82d   : > { %v2875_v28 = vsel %vm2872_vm14, %v2874_v6, %v2870_v4 }
 0x82e   : > { %2920 = vst [vmem:[%s4473_s6 + $0x68] sm:$0xff] %v2875_v28 }
 0x85c   : > { %v2598_v29 = vpop.f32.mrf.mxu0 }
 0x85d   : > { %v2599_v30 = vadd.f32 %v4458_v13, %v2598_v29 }
 0x85f   : > { %v3372_v27 = vmul.f32 -1.442695, %v2599_v30 }
 0x861   : > { %3540 = vpow2.f32 %v3372_v27 }
 0x864   : > { %v2600_v31 = vpop.f32.mrf.mxu0 }
 0x865   : > { %v2601_v32 = vadd.f32 %v4458_v13, %v2600_v31 }
 0x867   : > { %v3541_v33 = vpop.eup %3540  ;;  %v3373_v34 = vmul.f32 -1.442695, %v2601_v32 }
 0x868   : > { %v2665_v9 = vadd.f32 1.0, %v3541_v33 }
 0x869   : > { %3542 = vpow2.f32 %v3373_v34 }
 0x86a   : > { %3544 = vrcp.f32 %v2665_v9  ;;  %v2888_v40 = vand.u32 2147483648, %v2665_v9  ;;  %v2886_v41 = vand.u32 2147483647, %v2665_v9  ;;  %vm2882_vm15 = vweird.f32 %v2665_v9 }
 0x86c   : > { %v2889_v45 = vor.u32 1.1754944e-38, %v2888_v40  ;;  %vm2887_vm2 = vcmp.eq.f32.partialorder %v2886_v41, 8.507059e+37 }
 0x86f   : > { %v3543_v11 = vpop.eup %3542 }
 0x870   : > { %v3545_v35 = vpop.eup %3544  ;;  %v2666_v37 = vadd.f32 1.0, %v3543_v11 }
 0x871   : > { %v2878_v38 = vmul.f32 %v3545_v35, %v2665_v9  ;;  %vm2883_vm0 = vweird.f32 %v3545_v35 }
 0x872   : > { %3546 = vrcp.f32 %v2666_v37  ;;  %vm2884_vm1 = vmor %vm2882_vm15, %vm2883_vm0  ;;  %v2903_v39 = vand.u32 2147483648, %v2666_v37  ;;  %v2901_v48 = vand.u32 2147483647, %v2666_v37  ;;  %vm2897_vm4 = vweird.f32 %v2666_v37 }
 0x873   : > { %v2879_v17 = vsub.f32 1.0, %v2878_v38 }
 0x874   : > { %v2904_v46 = vor.u32 1.1754944e-38, %v2903_v39  ;;  %vm2902_vm6 = vcmp.eq.f32.partialorder %v2901_v48, 8.507059e+37 }
 0x875   : > { %v2880_v51 = vmul.f32 %v3545_v35, %v2879_v17 }
 0x877   : > { %v2881_v36 = vadd.f32 %v3545_v35, %v2880_v51 }
 0x878   : > { %v3547_v13 = vpop.eup %3546 }
 0x879   : > { %v2885_v42 = vsel %vm2884_vm1, %v3545_v35, %v2881_v36  ;;  %v2893_v61 = vmul.f32 %v3547_v13, %v2666_v37  ;;  %vm2898_vm3 = vweird.f32 %v3547_v13 }
 0x87a   : > { %v2890_v43 = vsel %vm2887_vm2, %v2889_v45, %v2885_v42  ;;  %vm2899_vm5 = vmor %vm2897_vm4, %vm2898_vm3 }
 0x87b   : > { %2921 = vst [vmem:[%s4473_s6 + $0x70] sm:$0xff] %v2890_v43  ;;  %v2894_v44 = vsub.f32 1.0, %v2893_v61 }
 0x87d   : > { %v2895_v47 = vmul.f32 %v3547_v13, %v2894_v44 }
 0x87f   : > { %v2896_v49 = vadd.f32 %v3547_v13, %v2895_v47 }
 0x881   : > { %v2900_v50 = vsel %vm2899_vm5, %v3547_v13, %v2896_v49 }
 0x882   : > { %v2905_v52 = vsel %vm2902_vm6, %v2904_v46, %v2900_v50 }
 0x883   : > { %2922 = vst [vmem:[%s4473_s6 + $0x78] sm:$0xff] %v2905_v52 }
 0x884   : > { %3575 = shalt.err (!%p3572_p3)
}
 0x885   : > { %s3614_s29 = smov 128   ;;  %s3615_s6 = smov 8  }
 0x886   : > { %3429 = dma.vmem_to_hbm [thread:$0]  (%p3794_p5), %s2958_s9, 2048, %s2960_s30, %s2940_s0, %s3614_s29, %s3614_s29, %s3615_s6  }
 0x887 PF: > { %s4629_s11 = sld [smem:[#allocation7_spill]] }
 0x888   : > { %s4630_s12 = sld [smem:[#allocation5_spill]] }
 0x88d   : > { %p3435_p4 = scmp.ge.s32.totalorder %s4629_s11, 2 }
 0x88e   : > { %s2978_s1 = sand.u32 1, %s4630_s12  }
 0x88f   : > { %p3432_p7 = pnand %p3435_p4, %p3798_p6  ;;  %s2979_s3 = scalar_lea.sflag [#allocation3], %s2978_s1 }
 0x891   : > { %p3433_p8 = pneg %p3432_p7 }
 0x893   : > { %3593 = dma.done.wait (%p3433_p8), %s2979_s3, 2048  }
 0x894   : > { %3595 = vsyncadd (%p3433_p8), %s2979_s3, 4294965248  ;;  %s4632_s30 = sld [smem:[#allocation8_spill]]  ;;  %s4635_s7 = smov %s3602_s4 }
 0x895   : > { %s4633_s2 = sld [smem:[#allocation6_spill]] }
 0x896   : > { %s4634_s8 = sld [smem:[#allocation9_spill]] }
 0x89a   : > { %p38_p9 = scmp.ge.s32.totalorder %s4632_s30, 4  }
 0x89b   : > { %s4636_s4 = smov %s4633_s2 }
 0x89c   :  { %40 = sbr.rel (!%p38_p9) target bundleno = 18 (0x12), region = 174 }
 0x8a1   :  { %2993 = vsyncpa [#allocation3], 1 }
 0x8a2   :  { %2995 = vsyncpa [#allocation3 + $0x1], 1 }

</bundles_post_ra>
